<compile_context>
chip_gen: v7x
topology: tpu7x:2x2x1
jax: 0.10.0
libtpu: 0.0.40
codegen_flags: <defaults>
</compile_context>

<pallas_src>
import jax
import jax.numpy as jnp
from jax import lax
from jax.experimental import pallas as pl
from jax.experimental.pallas import tpu as pltpu

_LANE = 128
_NBINS = 256          # level (255) padded to a lane-dense 256 (last bin empty)
_MAX_TILE_ROWS = 32   # 32*128 pixels per tile -> a few MiB of intermediates


def _counts_kernel(x_ref, later_ref, counts_ref):
    """Accumulate counts_le[k] = #{pixels <= later[k]} over pixel tiles."""
    @pl.when(pl.program_id(1) == 0)
    def _():
        counts_ref[...] = jnp.zeros_like(counts_ref)

    x = jnp.clip(x_ref[0], 0.0, 1.0)                        # (TR, 128)
    le = x[:, :, None] <= later_ref[0][None, None, :]       # (TR, 128, 256) bool
    # Reduce the outer (vreg-repeat) axis first on the VPU, then collapse the
    # 128-wide sublane axis (small XLU reduce).  int32 keeps counts exact.
    part = jnp.sum(le.astype(jnp.int32), axis=0)            # (128, 256)
    counts_ref[...] += jnp.sum(part, axis=0)[None, None, :]  # (1, 1, 256)


def _apply_kernel(x_ref, former_ref, pdf_ref, o_ref):
    """out[p] = sum_k pdf[k] * (x[p] > former[k])  ==  cdf[bin(x[p])]."""
    x = jnp.clip(x_ref[0], 0.0, 1.0)                        # (1, TPIX)
    mask = (x > former_ref[...]).astype(jnp.float32)        # (256, TPIX)
    # MXU does the weighted reduction over bins; output stays lane-dense.
    o_ref[0] = jnp.dot(pdf_ref[0], mask,
                       preferred_element_type=jnp.float32,
                       precision=lax.Precision.HIGHEST)     # (1, TPIX)


def adahister_forward(x, level=255):
    """x: (B, C, H, W) float array.  Returns the histogram-equalized image."""
    B, C, H, W = x.shape
    n_pix = C * H * W

    # Tile the flattened pixel axis; zero-pad to a whole number of tiles.
    rows = pl.cdiv(n_pix, _LANE)
    tile_rows = min(_MAX_TILE_ROWS, rows)
    rows_pad = pl.cdiv(rows, tile_rows) * tile_rows
    n_pad_pix = rows_pad * _LANE
    tile_pix = tile_rows * _LANE
    n_tiles = n_pad_pix // tile_pix
    n_extra = n_pad_pix - n_pix

    xf = x.reshape(B, n_pix).astype(jnp.float32)
    if n_extra:
        xf = jnp.pad(xf, ((0, 0), (0, n_extra)))

    # Bin edges padded to 256 lanes.  former[0] = -1 folds in torch's bin-0
    # special case; dummy bins (k >= level) get edges > 1 so they never match
    # and their pdf is zero.
    step = jnp.linspace(0.0, 1.0, level + 1, dtype=jnp.float32)
    pad_bins = _NBINS - level
    later = jnp.concatenate(
        [step[1:], jnp.full((pad_bins,), 2.0, jnp.float32)]).reshape(1, _NBINS)
    former = jnp.concatenate(
        [jnp.full((1,), -1.0, jnp.float32), step[1:level],
         jnp.full((pad_bins,), 2.0, jnp.float32)]).reshape(_NBINS, 1)

    # ---- Pass 1: per-image counts of {x <= later[k]} ------------------------
    x_rows = xf.reshape(B, rows_pad, _LANE)
    counts = pl.pallas_call(
        _counts_kernel,
        out_shape=jax.ShapeDtypeStruct((B, 1, _NBINS), jnp.int32),
        grid_spec=pltpu.PrefetchScalarGridSpec(
            num_scalar_prefetch=0,
            grid=(B, rows_pad // tile_rows),
            in_specs=[
                pl.BlockSpec((1, tile_rows, _LANE), lambda b, r: (b, r, 0)),
                pl.BlockSpec((1, _NBINS), lambda b, r: (0, 0)),
            ],
            out_specs=pl.BlockSpec((1, 1, _NBINS), lambda b, r: (b, 0, 0)),
        ),
        compiler_params=pltpu.CompilerParams(
            dimension_semantics=("parallel", "arbitrary")),
    )(x_rows, later)

    # Remove the zero padding (every bin counted all padded zeros) and turn the
    # cumulative counts into per-bin pdf, exactly like torch (bin_count / N).
    counts = counts[:, 0, :] - n_extra                        # (B, 256) int32
    prev = jnp.concatenate(
        [jnp.zeros((B, 1), jnp.int32), counts[:, :-1]], axis=1)
    pdf = (counts - prev).astype(jnp.float32) / float(n_pix)  # (B, 256)
    pdf = pdf.reshape(B, 1, _NBINS)

    # ---- Pass 2: per-pixel CDF lookup ---------------------------------------
    x_tiles = xf.reshape(B, n_tiles, tile_pix)
    out = pl.pallas_call(
        _apply_kernel,
        out_shape=jax.ShapeDtypeStruct((B, n_tiles, tile_pix), jnp.float32),
        grid_spec=pltpu.PrefetchScalarGridSpec(
            num_scalar_prefetch=0,
            grid=(B, n_tiles),
            in_specs=[
                pl.BlockSpec((1, 1, tile_pix), lambda b, t: (b, t, 0)),
                pl.BlockSpec((_NBINS, 1), lambda b, t: (0, 0)),
                pl.BlockSpec((1, 1, _NBINS), lambda b, t: (b, 0, 0)),
            ],
            out_specs=pl.BlockSpec((1, 1, tile_pix), lambda b, t: (b, t, 0)),
        ),
        compiler_params=pltpu.CompilerParams(
            dimension_semantics=("parallel", "parallel")),
    )(x_tiles, former, pdf)

    out = out.reshape(B, n_pad_pix)[:, :n_pix]
    return out.reshape(B, C, H, W)


def adahister_reference(x, level=255):
    """Pure-JAX mirror of the PyTorch forward, for verification."""
    step = jnp.linspace(0.0, 1.0, level + 1, dtype=jnp.float32)
    former, later = step[:-1], step[1:]
    B = x.shape[0]
    xc = jnp.clip(x, 0.0, 1.0).astype(jnp.float32)
    xf = xc.reshape(B, -1)
    lower = xf[:, :, None] > former[None, None, :]
    first = (xf >= former[0])[:, :, None]
    lower = jnp.concatenate([first, lower[:, :, 1:]], axis=-1)
    onehot = (lower & (xf[:, :, None] <= later[None, None, :])).astype(jnp.float32)
    pdf = onehot.sum(axis=1) / xf.shape[1]
    cdf = jnp.cumsum(pdf, axis=-1)
    out = jnp.sum(onehot * cdf[:, None, :], axis=-1)
    return out.reshape(x.shape)


if __name__ == "__main__":
    B, C, H, W = 2, 4, 16, 16
    level = 255

    key = jax.random.PRNGKey(0)
    # Include values outside [0, 1] to exercise the clamp.
    fusion = jax.random.uniform(
        key, (B, C, H, W), dtype=jnp.float32, minval=-0.25, maxval=1.25)

    out = adahister_forward(fusion, level=level)
    out = jax.block_until_ready(out)

    ref = adahister_reference(fusion, level=level)
    assert out.shape == (B, C, H, W) and out.dtype == jnp.float32
    err = jnp.max(jnp.abs(out - ref))
    assert jnp.allclose(out, ref, rtol=1e-5, atol=5e-5), f"max abs err {err}"

    print("KERNEL_OK")
</pallas_src>

<mosaic_0001>
module attributes {stable_mosaic.version = 11 : i64} {
  func.func @_counts_kernel(%arg0: i32, %arg1: i32, %arg2: memref<1x8x128xf32, #tpu.memory_space<vmem>>, %arg3: memref<1x256xf32, #tpu.memory_space<vmem>>, %arg4: memref<1x1x256xi32, #tpu.memory_space<vmem>>) attributes {dimension_semantics = [#tpu.dimension_semantics<parallel>, #tpu.dimension_semantics<arbitrary>], iteration_bounds = array<i64: 2, 1>, scalar_prefetch = 0 : i64, scratch_operands = 0 : i64, tpu.core_type = #tpu.core_type<tc>, window_params = [{transform_indices = @transform_0, window_bounds = array<i64: 1, 8, 128>}, {pipeline_mode = #tpu.pipeline_mode<synchronous>, transform_indices = @transform_1, window_bounds = array<i64: 1, 256>}, {transform_indices = @transform_2, window_bounds = array<i64: 1, 1, 256>}]} {
    %c0_i32 = arith.constant 0 : i32
    %0 = arith.cmpi eq, %arg1, %c0_i32 : i32
    %1 = arith.extui %0 : i1 to i32
    %c0_i32_0 = arith.constant 0 : i32
    %2 = arith.cmpi ne, %1, %c0_i32_0 : i32
    scf.if %2 {
      %c0_i32_14 = arith.constant 0 : i32
      %23 = vector.broadcast %c0_i32_14 : i32 to vector<1x1x256xi32>
      %c0_15 = arith.constant 0 : index
      %c0_16 = arith.constant 0 : index
      %c0_17 = arith.constant 0 : index
      %24 = vector.load %arg4[%c0_15, %c0_16, %c0_17] : memref<1x1x256xi32, #tpu.memory_space<vmem>>, vector<1x1x256xi32>
      tpu.vector_store %arg4[%c0_15, %c0_16, %c0_17], %23 {strides = array<i32>} : memref<1x1x256xi32, #tpu.memory_space<vmem>>, vector<1x1x256xi32>,
    } else {
    }
    %c0 = arith.constant 0 : index
    %c0_1 = arith.constant 0 : index
    %c0_2 = arith.constant 0 : index
    %3 = vector.load %arg2[%c0, %c0_1, %c0_2] : memref<1x8x128xf32, #tpu.memory_space<vmem>>, vector<1x8x128xf32>
    %4 = vector.shape_cast %3 : vector<1x8x128xf32> to vector<8x128xf32>
    %cst = arith.constant 0.000000e+00 : f32
    %cst_3 = arith.constant 1.000000e+00 : f32
    %5 = vector.broadcast %cst : f32 to vector<8x128xf32>
    %6 = arith.maximumf %5, %4 : vector<8x128xf32>
    %7 = vector.broadcast %cst_3 : f32 to vector<8x128xf32>
    %8 = arith.minimumf %7, %6 : vector<8x128xf32>
    %9 = vector.shape_cast %8 : vector<8x128xf32> to vector<8x128x1xf32>
    %c0_4 = arith.constant 0 : index
    %c0_5 = arith.constant 0 : index
    %10 = vector.load %arg3[%c0_4, %c0_5] : memref<1x256xf32, #tpu.memory_space<vmem>>, vector<1x256xf32>
    %11 = vector.shape_cast %10 : vector<1x256xf32> to vector<256xf32>
    %12 = vector.shape_cast %11 : vector<256xf32> to vector<1x1x256xf32>
    %13 = vector.broadcast %9 : vector<8x128x1xf32> to vector<8x128x256xf32>
    %14 = vector.broadcast %12 : vector<1x1x256xf32> to vector<8x128x256xf32>
    %15 = arith.cmpf ole, %13, %14 : vector<8x128x256xf32>
    %16 = arith.extui %15 : vector<8x128x256xi1> to vector<8x128x256xi32>
    %cst_6 = arith.constant dense<0> : vector<128x256xi32>
    %17 = vector.multi_reduction <add>, %16, %cst_6 [0] : vector<8x128x256xi32> to vector<128x256xi32>
    %c0_7 = arith.constant 0 : index
    %c0_8 = arith.constant 0 : index
    %c0_9 = arith.constant 0 : index
    %18 = vector.load %arg4[%c0_7, %c0_8, %c0_9] : memref<1x1x256xi32, #tpu.memory_space<vmem>>, vector<1x1x256xi32>
    %cst_10 = arith.constant dense<0> : vector<256xi32>
    %19 = vector.multi_reduction <add>, %17, %cst_10 [0] : vector<128x256xi32> to vector<256xi32>
    %20 = vector.shape_cast %19 : vector<256xi32> to vector<1x1x256xi32>
    %21 = arith.addi %18, %20 : vector<1x1x256xi32>
    %c0_11 = arith.constant 0 : index
    %c0_12 = arith.constant 0 : index
    %c0_13 = arith.constant 0 : index
    %22 = vector.load %arg4[%c0_11, %c0_12, %c0_13] : memref<1x1x256xi32, #tpu.memory_space<vmem>>, vector<1x1x256xi32>
    tpu.vector_store %arg4[%c0_11, %c0_12, %c0_13], %21 {strides = array<i32>} : memref<1x1x256xi32, #tpu.memory_space<vmem>>, vector<1x1x256xi32>,
    return
  }
  func.func @transform_0(%arg0: i32, %arg1: i32) -> (i32, i32, i32) {
    %c0_i32 = arith.constant 0 : i32
    %c0_i32_0 = arith.constant 0 : i32
    return %arg0, %arg1, %c0_i32 : i32, i32, i32
  }
  func.func @transform_1(%arg0: i32, %arg1: i32) -> (i32, i32) {
    %c0_i32 = arith.constant 0 : i32
    %c0_i32_0 = arith.constant 0 : i32
    %c0_i32_1 = arith.constant 0 : i32
    return %c0_i32, %c0_i32_0 : i32, i32
  }
  func.func @transform_2(%arg0: i32, %arg1: i32) -> (i32, i32, i32) {
    %c0_i32 = arith.constant 0 : i32
    %c0_i32_0 = arith.constant 0 : i32
    %c0_i32_1 = arith.constant 0 : i32
    return %arg0, %c0_i32, %c0_i32_0 : i32, i32, i32
  }
}

</mosaic_0001>

<bundles_post_ra>
// kernel: tpu_custom_call.1
= control target key start
LH: loop header
LB: loop body
LE: loop exit
PB: predicated region body
PF: predicated region fallthrough
CT: control target
= control target key end

     0   :  { %7 = vsyncpa [#allocation3], 0  ;;  %s2644_s0 = inlined_call_operand.hbm [shape: f32[2,8,128], index: 0, kind: input, shape index: {}]   ;;  %s2645_s1 = inlined_call_operand.vmem [shape: f32[1,256], index: 1, kind: input, shape index: {}]   ;;  %s2646_s2 = inlined_call_operand.hbm [shape: s32[2,1,256], index: 2, kind: output, shape index: {}]  }
   0x1   :  { %9 = vsyncpa [#allocation3 + $0x1], 0 }
   0x2   :  { %10 = vsyncpa [#allocation4], 0 }
   0x3   :  { %12 = vsyncpa [#allocation4 + $0x1], 0  ;;  %s1840_s9 = smov 0   ;;  %s1842_s10 = smov 0  }
   0x4   :  { %s1844_s11 = smov 0   ;;  %s1846_s12 = smov 0  }
   0x5   :  { %s1848_s13 = smov 0   ;;  %s1850_s14 = smov 0  }
   0x6 LB: > { %s1628_s15 = sadd.s32 4294967295, %s1819_s14   ;;  %s1629_s16 = sadd.s32 4294967294, %s1819_s14   ;;  %s1819_s14 = sphi %s1850_s14, %s18_s14   ;;  %s1815_s13 = sphi %s1848_s13, %s2664_s13   ;;  %s1811_s12 = sphi %s1846_s12, %s2663_s12   ;;  %s1807_s11 = sphi %s1844_s11, %s2662_s11   ;;  %s1803_s10 = sphi %s1842_s10, %s2661_s10   ;;  %s1799_s9 = sphi %s1840_s9, %s2660_s9  }
   0x7   : > { %s30_s17 = sadd.s32 1, %s1815_s13  ;;  %s39_s18 = sadd.s32 1, %s1807_s11 }
   0x8   : > { %p32_p0 = scmp.ge.s32.totalorder %s30_s17, 2  ;;  %p46_p1 = scmp.ne.s32.totalorder %s1807_s11, %s1803_s10 }
   0x9   : > { %p47_p2 = scmp.eq.s32.totalorder %s1819_s14, 0  ;;  %p52_p3 = scmp.ne.s32.totalorder %s1803_s10, %s1799_s9 }
   0xa   : > { %s2666_s17 = smov (%p32_p0, %s30_s17), 0  ;;  %p53_p5 = scmp.eq.s32.totalorder %s1628_s15, 0 }
   0xb   : > { %p1881_p4 = por %p47_p2, %p46_p1  ;;  %s34_s20 = ssub.s32 %s1815_s13, %s2666_s17 }
   0xc   : > { %p97_p6 = scmp.eq.s32.totalorder %s1628_s15, 1  ;;  %p37_p7 = scmp.eq.s32.totalorder %s34_s20, 0 }
   0xd   : > { %p1887_p8 = por %p53_p5, %p52_p3  ;;  %p103_p10 = scmp.eq.s32.totalorder %s1629_s16, 1 }
   0xe   : > { %p1891_p9 = por %p97_p6, %p46_p1  ;;  %p1655_p13 = scmp.lt.s32.totalorder %s1819_s14, 2 }
   0xf   : > { %s1896_s23 = scalar_select %p37_p7, %s1807_s11, %s39_s18  }
  0x10   : > { %s2650_s22 = scalar_select %p1891_p9, 1, 0 }
  0x11   : > { %p1898_p11 = por %p103_p10, %p52_p3  ;;  %s126_s25 = sand.u32 1, %s1807_s11  }
  0x12   : > { %s1632_s26 = sshll.u32 %s126_s25, 3  ;;  %s1633_s27 = sshll.u32 %s1815_s13, 7 }
  0x13   : > { %s2651_s24 = scalar_select %p1898_p11, 1, 0 }
  0x14   : > { %s1909_s30 = scalar_lea.hbm %s2644_s0, %s1633_s27  ;;  %s130_s3 = scalar_lea.vmem [#allocation2], %s1632_s26 }
  0x15   : > { %s138_s4 = sshll.u32 %s130_s3, 4  ;;  %p1915_p0 = pnand %p1655_p13, %p1881_p4  ;;  %s1911_s4 = int_to_ptr.vmem [resolvable:$true] %s138_s4 }
  0x16   : > { %s127_s6 = scalar_lea.sflag [#allocation3], %s126_s25  ;;  %s1707_s7 = scalar_lea.hbm %s1909_s30, 128 }
  0x17   : > { %p1708_p3 = scmp.ne.s32.totalorder %s1909_s30, %s1707_s7  ;;  %p1709_p5 = pneg %p1915_p0 }
  0x18   : > { %s1712_s16 = scalar_lea.hbm %s2644_s0, 256  ;;  %p1713_p4 = scmp.lt.u32.totalorder %s1909_s30, %s2644_s0 }
  0x19   : > { %p1710_p6 = pnand %p1709_p5, %p1708_p3  ;;  %p1714_p10 = scmp.lt.u32.totalorder %s1712_s16, %s1707_s7 }
  0x1a   : > { %p1716_p12 = scmp.lt.u32.totalorder %s1707_s7, %s1909_s30 }
  0x1b   : > { %p1711_p7 = pneg %p1710_p6  ;;  %p1715_p13 = por %p1714_p10, %p1713_p4 }
  0x1d   : > { %p1717_p1 = por %p1716_p12, %p1715_p13 }
  0x1f   : > { %p1718_p2 = pnand %p1717_p1, %p1711_p7 }
  0x21   : > { %1721 = shalt.err (!%p1718_p2)
}
  0x22   : > { %s1722_s20 = scalar_lea.vmem %s1911_s4, 128  ;;  %s1821_s25 = smov [#allocation2]  }
  0x23   : > { %p1723_p3 = scmp.ne.s32.totalorder %s1911_s4, %s1722_s20  ;;  %s1727_s26 = sshll.u32 %s1821_s25, 4  ;;  %s1728_s26 = int_to_ptr.vmem [resolvable:$false] %s1727_s26 }
  0x24   : > { %s1729_s27 = scalar_lea.vmem %s1728_s26, 256  ;;  %p1730_p9 = scmp.lt.s32.totalorder %s1911_s4, %s1728_s26 }
  0x25   : > { %p1725_p6 = pnand %p1723_p3, %p1709_p5  ;;  %p1731_p4 = scmp.lt.s32.totalorder %s1729_s27, %s1722_s20 }
  0x27   : > { %p1726_p11 = pneg %p1725_p6  ;;  %p1732_p10 = por %p1731_p4, %p1730_p9 }
  0x29   : > { %p1733_p12 = pnand %p1732_p10, %p1726_p11 }
  0x2b   : > { %1736 = shalt.err (!%p1733_p12)
}
  0x2c   : > { %1650 = dma.hbm_to_vmem [thread:$0]  (!%p1915_p0), %s1909_s30, 128, %s1911_s4, %s127_s6  }
  0x2d   : > { %p2653_p1 = scmp.lt.s32.totalorder %s1819_s14, 3  ;;  %p2654_p2 = scmp.ge.s32.totalorder %s1819_s14, 1 }
  0x2f   : > { %p144_p5 = pnand %p2654_p2, %p2653_p1 }
  0x30   : > { %s1951_s28 = sand.u32 (!%p144_p5), 1, %s1803_s10  }
  0x31   : > { %147 = sbr.rel (%p144_p5) target bundleno = 472 (0x1d8), region = 28  ;;  %s1635_s29 = sshll.u32 (!%p144_p5), %s1951_s28, 3 }
  0x32   : > { %s150_s3 = scalar_lea.sflag (!%p144_p5), [#allocation3], %s1951_s28  ;;  %s153_s7 = scalar_lea.vmem (!%p144_p5), [#allocation2], %s1635_s29 }
  0x38   : > { %1790 = dma.done.wait (%p1887_p8), %s150_s3, 128  }
  0x39   : > { %1792 = vsyncadd (%p1887_p8), %s150_s3, 4294967168  ;;  %s1636_s30 = sshll.u32 %s1951_s28, 1  ;;  %v178_v0 = vlaneseq  ;;  %v1822_v2 = vmov 0   ;;  %v183_v4 = vld [vmem:[%s153_s7] sm:$0xff]  ;;  %s1642_s6 = sshll.u32 %s1811_s12, 5 }
  0x3a   : > { %s1964_s4 = scalar_lea.vmem [#allocation5], %s1636_s30  ;;  %v184_v5 = vmax.f32 %v183_v4, 0.0  ;;  %v722_v15 = vld [vmem:[%s2645_s1] sm:$0x3]  ;;  %s2592_s18 = scalar_lea.hbm %s2646_s2, %s1642_s6 }
  0x3b   : > { %vm1960_vm0 = vcmp.lt.s32.totalorder %v178_v0, 256  ;;  %v1970_v3 = vshrl.u32 %v178_v0, 7  ;;  %s1549_s8 = sshll.u32 %s1964_s4, 4  ;;  %s1535_s19 = scalar_lea.sflag [#allocation4], %s1951_s28  ;;  %s2594_s8 = int_to_ptr.vmem [resolvable:$true] %s1549_s8 }
  0x3c   : > { %182 = vst.msk [vmem:[%s1964_s4] sm:$0x3] %vm1960_vm0, %v1822_v2  ;;  %v1973_v7 = vmin.f32 %v184_v5, 1.0  ;;  %s1737_s20 = scalar_lea.vmem %s2594_s8, 32  ;;  %p2657_p9 = scmp.ne.s32.totalorder %s2650_s22, 0 }
  0x3d   : > { %v188_v6 = vsub.s32 0, %v1970_v3  ;;  %v255_v9 = vsub.s32 1, %v1970_v3  ;;  %v322_v11 = vsub.s32 2, %v1970_v3  ;;  %v389_v13 = vsub.s32 3, %v1970_v3  ;;  %p1738_p8 = scmp.ne.s32.totalorder %s2594_s8, %s1737_s20  ;;  %s1824_s12 = smov [#allocation5]  }
  0x3e   : > { %v456_v24 = vsub.s32 4, %v1970_v3  ;;  %s1741_s25 = sshll.u32 %s1824_s12, 4  ;;  %s1742_s25 = int_to_ptr.vmem [resolvable:$false] %s1741_s25 }
  0x3f   : > { %v189_v8 = vrot.slane %v1973_v7, %v188_v6  ;;  %v256_v10 = vrot.slane %v1973_v7, %v255_v9  ;;  %v323_v12 = vrot.slane %v1973_v7, %v322_v11  ;;  %v390_v14 = vrot.slane %v1973_v7, %v389_v13  ;;  %p1739_p11 = pnand %p1738_p8, %p2657_p9  ;;  %s1743_s26 = scalar_lea.vmem %s1742_s25, 64 }
  0x40   : > { %v1989_v16 = vrot.slane %v722_v15, %v188_v6  ;;  %v1991_v17 = vrot.slane %v722_v15, %v255_v9  ;;  %v2011_v35 = vrot.slane %v1973_v7, %v456_v24  ;;  %p1744_p7 = scmp.lt.s32.totalorder %s2594_s8, %s1742_s25  ;;  %p1745_p13 = scmp.lt.s32.totalorder %s1743_s26, %s1737_s20 }
  0x41   : > { %199 = vbcast.lane.b32.xlu1 %v189_v8, 272  ;;  %191 = vbcast.lane.b32.xlu0 %v189_v8, 256  ;;  %p1740_p0 = pneg %p1739_p11 }
  0x42   : > { %p1746_p3 = por %p1745_p13, %p1744_p7 }
  0x44   : > { %p1747_p6 = pnand %p1746_p3, %p1740_p0 }
  0x45   : > { %203 = vbcast.lane.b32.xlu1 %v189_v8, 280  ;;  %195 = vbcast.lane.b32.xlu0 %v189_v8, 264 }
  0x49   : > { %211 = vbcast.lane.b32.xlu1 %v189_v8, 296  ;;  %207 = vbcast.lane.b32.xlu0 %v189_v8, 288 }
  0x4d   : > { %219 = vbcast.lane.b32.xlu1 %v189_v8, 312  ;;  %215 = vbcast.lane.b32.xlu0 %v189_v8, 304 }
  0x51   : > { %227 = vbcast.lane.b32.xlu1 %v189_v8, 328  ;;  %223 = vbcast.lane.b32.xlu0 %v189_v8, 320 }
  0x55   : > { %235 = vbcast.lane.b32.xlu1 %v189_v8, 344  ;;  %231 = vbcast.lane.b32.xlu0 %v189_v8, 336 }
  0x59   : > { %243 = vbcast.lane.b32.xlu1 %v189_v8, 360  ;;  %239 = vbcast.lane.b32.xlu0 %v189_v8, 352 }
  0x5d   : > { %251 = vbcast.lane.b32.xlu1 %v189_v8, 376  ;;  %247 = vbcast.lane.b32.xlu0 %v189_v8, 368 }
  0x61   : > { %262 = vbcast.lane.b32.xlu1 %v256_v10, 264  ;;  %258 = vbcast.lane.b32.xlu0 %v256_v10, 256 }
  0x65   : > { %270 = vbcast.lane.b32.xlu1 %v256_v10, 280  ;;  %266 = vbcast.lane.b32.xlu0 %v256_v10, 272 }
  0x69   : > { %278 = vbcast.lane.b32.xlu1 %v256_v10, 296  ;;  %274 = vbcast.lane.b32.xlu0 %v256_v10, 288 }
  0x6d   : > { %286 = vbcast.lane.b32.xlu1 %v256_v10, 312  ;;  %282 = vbcast.lane.b32.xlu0 %v256_v10, 304 }
  0x71   : > { %294 = vbcast.lane.b32.xlu1 %v256_v10, 328  ;;  %290 = vbcast.lane.b32.xlu0 %v256_v10, 320 }
  0x75   : > { %302 = vbcast.lane.b32.xlu1 %v256_v10, 344  ;;  %298 = vbcast.lane.b32.xlu0 %v256_v10, 336 }
  0x79   : > { %310 = vbcast.lane.b32.xlu1 %v256_v10, 360  ;;  %306 = vbcast.lane.b32.xlu0 %v256_v10, 352 }
  0x7d   : > { %318 = vbcast.lane.b32.xlu1 %v256_v10, 376  ;;  %314 = vbcast.lane.b32.xlu0 %v256_v10, 368 }
  0x81   : > { %329 = vbcast.lane.b32.xlu1 %v323_v12, 264  ;;  %325 = vbcast.lane.b32.xlu0 %v323_v12, 256 }
  0x85   : > { %337 = vbcast.lane.b32.xlu1 %v323_v12, 280  ;;  %333 = vbcast.lane.b32.xlu0 %v323_v12, 272 }
  0x89   : > { %345 = vbcast.lane.b32.xlu1 %v323_v12, 296  ;;  %341 = vbcast.lane.b32.xlu0 %v323_v12, 288 }
  0x8d   : > { %353 = vbcast.lane.b32.xlu1 %v323_v12, 312  ;;  %349 = vbcast.lane.b32.xlu0 %v323_v12, 304 }
  0x91   : > { %361 = vbcast.lane.b32.xlu1 %v323_v12, 328  ;;  %357 = vbcast.lane.b32.xlu0 %v323_v12, 320 }
  0x95   : > { %369 = vbcast.lane.b32.xlu1 %v323_v12, 344  ;;  %365 = vbcast.lane.b32.xlu0 %v323_v12, 336 }
  0x99   : > { %377 = vbcast.lane.b32.xlu1 %v323_v12, 360  ;;  %373 = vbcast.lane.b32.xlu0 %v323_v12, 352 }
  0x9d   : > { %385 = vbcast.lane.b32.xlu1 %v323_v12, 376  ;;  %381 = vbcast.lane.b32.xlu0 %v323_v12, 368 }
  0xa1   : > { %396 = vbcast.lane.b32.xlu1 %v390_v14, 264  ;;  %392 = vbcast.lane.b32.xlu0 %v390_v14, 256 }
  0xa5   : > { %404 = vbcast.lane.b32.xlu1 %v390_v14, 280  ;;  %400 = vbcast.lane.b32.xlu0 %v390_v14, 272 }
  0xa9   : > { %412 = vbcast.lane.b32.xlu1 %v390_v14, 296  ;;  %408 = vbcast.lane.b32.xlu0 %v390_v14, 288 }
  0xad   : > { %420 = vbcast.lane.b32.xlu1 %v390_v14, 312  ;;  %416 = vbcast.lane.b32.xlu0 %v390_v14, 304 }
  0xb1   : > { %428 = vbcast.lane.b32.xlu1 %v390_v14, 328  ;;  %424 = vbcast.lane.b32.xlu0 %v390_v14, 320 }
  0xb3   : > { %v200_v18 = vpop.permute.xlu1 %199  ;;  %v192_v19 = vpop.permute.xlu0 %191 }
  0xb4   : > { %vm738_vm1 = vcmp.le.f32.partialorder %v200_v18, %v1989_v16  ;;  %vm739_vm2 = vcmp.le.f32.partialorder %v200_v18, %v1991_v17  ;;  %vm734_vm3 = vcmp.le.f32.partialorder %v192_v19, %v1989_v16  ;;  %vm735_vm4 = vcmp.le.f32.partialorder %v192_v19, %v1991_v17 }
  0xb5   : > { %v994_v20 = vsel %vm738_vm1, 1, %v1822_v2  ;;  %v995_v21 = vsel %vm739_vm2, 1, %v1822_v2  ;;  %v990_v22 = vsel %vm734_vm3, 1, %v1822_v2  ;;  %v991_v23 = vsel %vm735_vm4, 1, %v1822_v2  ;;  %436 = vbcast.lane.b32.xlu1 %v390_v14, 344  ;;  %432 = vbcast.lane.b32.xlu0 %v390_v14, 336 }
  0xb6   : > { %v1260_v25 = vadd.s32 %v994_v20, %v990_v22  ;;  %v1267_v26 = vadd.s32 %v995_v21, %v991_v23 }
  0xb7   : > { %v204_v27 = vpop.permute.xlu1 %203  ;;  %v196_v28 = vpop.permute.xlu0 %195 }
  0xb8   : > { %vm740_vm5 = vcmp.le.f32.partialorder %v204_v27, %v1989_v16  ;;  %vm741_vm6 = vcmp.le.f32.partialorder %v204_v27, %v1991_v17  ;;  %vm736_vm7 = vcmp.le.f32.partialorder %v196_v28, %v1989_v16  ;;  %vm737_vm8 = vcmp.le.f32.partialorder %v196_v28, %v1991_v17 }
  0xb9   : > { %v996_v29 = vsel %vm740_vm5, 1, %v1822_v2  ;;  %v997_v30 = vsel %vm741_vm6, 1, %v1822_v2  ;;  %v992_v31 = vsel %vm736_vm7, 1, %v1822_v2  ;;  %v993_v32 = vsel %vm737_vm8, 1, %v1822_v2  ;;  %444 = vbcast.lane.b32.xlu1 %v390_v14, 360  ;;  %440 = vbcast.lane.b32.xlu0 %v390_v14, 352 }
  0xba   : > { %v1246_v33 = vadd.s32 %v1260_v25, %v996_v29  ;;  %v1253_v34 = vadd.s32 %v1267_v26, %v997_v30  ;;  %v523_v28 = vsub.s32 5, %v1970_v3 }
  0xbb   : > { %v212_v36 = vpop.permute.xlu1 %211  ;;  %v208_v37 = vpop.permute.xlu0 %207 }
  0xbc   : > { %v1288_v38 = vadd.s32 %v1246_v33, %v992_v31  ;;  %v1295_v39 = vadd.s32 %v1253_v34, %v993_v32  ;;  %vm744_vm9 = vcmp.le.f32.partialorder %v212_v36, %v1989_v16  ;;  %vm745_vm10 = vcmp.le.f32.partialorder %v212_v36, %v1991_v17 }
  0xbd   : > { %v1000_v40 = vsel %vm744_vm9, 1, %v1822_v2  ;;  %v1001_v41 = vsel %vm745_vm10, 1, %v1822_v2  ;;  %vm742_vm11 = vcmp.le.f32.partialorder %v208_v37, %v1989_v16  ;;  %vm743_vm12 = vcmp.le.f32.partialorder %v208_v37, %v1991_v17  ;;  %452 = vbcast.lane.b32.xlu1 %v390_v14, 376  ;;  %448 = vbcast.lane.b32.xlu0 %v390_v14, 368 }
  0xbe   : > { %v1274_v42 = vadd.s32 %v1288_v38, %v1000_v40  ;;  %v1281_v43 = vadd.s32 %v1295_v39, %v1001_v41  ;;  %v998_v44 = vsel %vm742_vm11, 1, %v1822_v2  ;;  %v999_v45 = vsel %vm743_vm12, 1, %v1822_v2 }
  0xbf   : > { %v220_v46 = vpop.permute.xlu1 %219  ;;  %v216_v47 = vpop.permute.xlu0 %215  ;;  %v2073_v40 = vrot.slane %v1973_v7, %v523_v28 }
  0xc0   : > { %v1316_v48 = vadd.s32 %v1274_v42, %v998_v44  ;;  %v1323_v49 = vadd.s32 %v1281_v43, %v999_v45  ;;  %vm748_vm13 = vcmp.le.f32.partialorder %v220_v46, %v1989_v16  ;;  %vm749_vm14 = vcmp.le.f32.partialorder %v220_v46, %v1991_v17 }
  0xc1   : > { %v1004_v50 = vsel %vm748_vm13, 1, %v1822_v2  ;;  %v1005_v51 = vsel %vm749_vm14, 1, %v1822_v2  ;;  %vm746_vm15 = vcmp.le.f32.partialorder %v216_v47, %v1989_v16  ;;  %vm747_vm1 = vcmp.le.f32.partialorder %v216_v47, %v1991_v17  ;;  %463 = vbcast.lane.b32.xlu1 %v2011_v35, 264  ;;  %459 = vbcast.lane.b32.xlu0 %v2011_v35, 256 }
  0xc2   : > { %v1302_v52 = vadd.s32 %v1316_v48, %v1004_v50  ;;  %v1309_v53 = vadd.s32 %v1323_v49, %v1005_v51  ;;  %v1002_v54 = vsel %vm746_vm15, 1, %v1822_v2  ;;  %v1003_v55 = vsel %vm747_vm1, 1, %v1822_v2 }
  0xc3   : > { %v228_v56 = vpop.permute.xlu1 %227  ;;  %v224_v57 = vpop.permute.xlu0 %223 }
  0xc4   : > { %v1344_v58 = vadd.s32 %v1302_v52, %v1002_v54  ;;  %v1351_v59 = vadd.s32 %v1309_v53, %v1003_v55  ;;  %vm752_vm2 = vcmp.le.f32.partialorder %v228_v56, %v1989_v16  ;;  %vm753_vm3 = vcmp.le.f32.partialorder %v228_v56, %v1991_v17 }
  0xc5   : > { %v1008_v60 = vsel %vm752_vm2, 1, %v1822_v2  ;;  %v1009_v61 = vsel %vm753_vm3, 1, %v1822_v2  ;;  %vm750_vm4 = vcmp.le.f32.partialorder %v224_v57, %v1989_v16  ;;  %vm751_vm5 = vcmp.le.f32.partialorder %v224_v57, %v1991_v17  ;;  %471 = vbcast.lane.b32.xlu1 %v2011_v35, 280  ;;  %467 = vbcast.lane.b32.xlu0 %v2011_v35, 272 }
  0xc6   : > { %v1330_v62 = vadd.s32 %v1344_v58, %v1008_v60  ;;  %v1337_v63 = vadd.s32 %v1351_v59, %v1009_v61  ;;  %v1006_v0 = vsel %vm750_vm4, 1, %v1822_v2  ;;  %v1007_v4 = vsel %vm751_vm5, 1, %v1822_v2 }
  0xc7   : > { %v236_v5 = vpop.permute.xlu1 %235  ;;  %v232_v6 = vpop.permute.xlu0 %231  ;;  %v590_v61 = vsub.s32 6, %v1970_v3 }
  0xc8   : > { %v1372_v8 = vadd.s32 %v1330_v62, %v1006_v0  ;;  %v1379_v9 = vadd.s32 %v1337_v63, %v1007_v4  ;;  %vm756_vm6 = vcmp.le.f32.partialorder %v236_v5, %v1989_v16  ;;  %vm757_vm7 = vcmp.le.f32.partialorder %v236_v5, %v1991_v17 }
  0xc9   : > { %v1012_v10 = vsel %vm756_vm6, 1, %v1822_v2  ;;  %v1013_v11 = vsel %vm757_vm7, 1, %v1822_v2  ;;  %vm754_vm8 = vcmp.le.f32.partialorder %v232_v6, %v1989_v16  ;;  %vm755_vm9 = vcmp.le.f32.partialorder %v232_v6, %v1991_v17  ;;  %479 = vbcast.lane.b32.xlu1 %v2011_v35, 296  ;;  %475 = vbcast.lane.b32.xlu0 %v2011_v35, 288 }
  0xca   : > { %v1358_v12 = vadd.s32 %v1372_v8, %v1012_v10  ;;  %v1365_v13 = vadd.s32 %v1379_v9, %v1013_v11  ;;  %v1010_v14 = vsel %vm754_vm8, 1, %v1822_v2  ;;  %v1011_v15 = vsel %vm755_vm9, 1, %v1822_v2 }
  0xcb   : > { %v244_v18 = vpop.permute.xlu1 %243  ;;  %v240_v19 = vpop.permute.xlu0 %239 }
  0xcc   : > { %v1400_v20 = vadd.s32 %v1358_v12, %v1010_v14  ;;  %v1407_v21 = vadd.s32 %v1365_v13, %v1011_v15  ;;  %vm760_vm10 = vcmp.le.f32.partialorder %v244_v18, %v1989_v16  ;;  %vm761_vm11 = vcmp.le.f32.partialorder %v244_v18, %v1991_v17 }
  0xcd   : > { %v1016_v22 = vsel %vm760_vm10, 1, %v1822_v2  ;;  %v1017_v23 = vsel %vm761_vm11, 1, %v1822_v2  ;;  %vm758_vm12 = vcmp.le.f32.partialorder %v240_v19, %v1989_v16  ;;  %vm759_vm13 = vcmp.le.f32.partialorder %v240_v19, %v1991_v17  ;;  %487 = vbcast.lane.b32.xlu1 %v2011_v35, 312  ;;  %483 = vbcast.lane.b32.xlu0 %v2011_v35, 304 }
  0xce   : > { %v1386_v24 = vadd.s32 %v1400_v20, %v1016_v22  ;;  %v1393_v25 = vadd.s32 %v1407_v21, %v1017_v23  ;;  %v1014_v26 = vsel %vm758_vm12, 1, %v1822_v2  ;;  %v1015_v27 = vsel %vm759_vm13, 1, %v1822_v2 }
  0xcf   : > { %v252_v29 = vpop.permute.xlu1 %251  ;;  %v248_v30 = vpop.permute.xlu0 %247  ;;  %v2107_v12 = vrot.slane %v1973_v7, %v590_v61 }
  0xd0   : > { %v1428_v31 = vadd.s32 %v1386_v24, %v1014_v26  ;;  %v1435_v32 = vadd.s32 %v1393_v25, %v1015_v27  ;;  %vm764_vm14 = vcmp.le.f32.partialorder %v252_v29, %v1989_v16  ;;  %vm765_vm15 = vcmp.le.f32.partialorder %v252_v29, %v1991_v17 }
  0xd1   : > { %v1020_v33 = vsel %vm764_vm14, 1, %v1822_v2  ;;  %v1021_v34 = vsel %vm765_vm15, 1, %v1822_v2  ;;  %vm762_vm1 = vcmp.le.f32.partialorder %v248_v30, %v1989_v16  ;;  %vm763_vm2 = vcmp.le.f32.partialorder %v248_v30, %v1991_v17  ;;  %495 = vbcast.lane.b32.xlu1 %v2011_v35, 328  ;;  %491 = vbcast.lane.b32.xlu0 %v2011_v35, 320 }
  0xd2   : > { %v1414_v36 = vadd.s32 %v1428_v31, %v1020_v33  ;;  %v1421_v37 = vadd.s32 %v1435_v32, %v1021_v34  ;;  %v1018_v38 = vsel %vm762_vm1, 1, %v1822_v2  ;;  %v1019_v39 = vsel %vm763_vm2, 1, %v1822_v2 }
  0xd3   : > { %v263_v41 = vpop.permute.xlu1 %262  ;;  %v259_v42 = vpop.permute.xlu0 %258 }
  0xd4   : > { %v1456_v43 = vadd.s32 %v1414_v36, %v1018_v38  ;;  %v1463_v44 = vadd.s32 %v1421_v37, %v1019_v39  ;;  %vm768_vm3 = vcmp.le.f32.partialorder %v263_v41, %v1989_v16  ;;  %vm769_vm4 = vcmp.le.f32.partialorder %v263_v41, %v1991_v17 }
  0xd5   : > { %v1024_v45 = vsel %vm768_vm3, 1, %v1822_v2  ;;  %v1025_v46 = vsel %vm769_vm4, 1, %v1822_v2  ;;  %vm766_vm5 = vcmp.le.f32.partialorder %v259_v42, %v1989_v16  ;;  %vm767_vm6 = vcmp.le.f32.partialorder %v259_v42, %v1991_v17  ;;  %503 = vbcast.lane.b32.xlu1 %v2011_v35, 344  ;;  %499 = vbcast.lane.b32.xlu0 %v2011_v35, 336 }
  0xd6   : > { %v1442_v47 = vadd.s32 %v1456_v43, %v1024_v45  ;;  %v1449_v48 = vadd.s32 %v1463_v44, %v1025_v46  ;;  %v1022_v49 = vsel %vm766_vm5, 1, %v1822_v2  ;;  %v1023_v50 = vsel %vm767_vm6, 1, %v1822_v2 }
  0xd7   : > { %v271_v51 = vpop.permute.xlu1 %270  ;;  %v267_v52 = vpop.permute.xlu0 %266 }
  0xd8   : > { %v1261_v53 = vadd.s32 %v1442_v47, %v1022_v49  ;;  %v1268_v54 = vadd.s32 %v1449_v48, %v1023_v50  ;;  %vm772_vm7 = vcmp.le.f32.partialorder %v271_v51, %v1989_v16  ;;  %vm773_vm8 = vcmp.le.f32.partialorder %v271_v51, %v1991_v17 }
  0xd9   : > { %v1028_v55 = vsel %vm772_vm7, 1, %v1822_v2  ;;  %v1029_v56 = vsel %vm773_vm8, 1, %v1822_v2  ;;  %vm770_vm9 = vcmp.le.f32.partialorder %v267_v52, %v1989_v16  ;;  %vm771_vm10 = vcmp.le.f32.partialorder %v267_v52, %v1991_v17  ;;  %526 = vbcast.lane.b32.xlu1 %v2073_v40, 256  ;;  %507 = vbcast.lane.b32.xlu0 %v2011_v35, 352 }
  0xda   : > { %v1247_v57 = vadd.s32 %v1261_v53, %v1028_v55  ;;  %v1254_v58 = vadd.s32 %v1268_v54, %v1029_v56  ;;  %v1026_v59 = vsel %vm770_vm9, 1, %v1822_v2  ;;  %v1027_v60 = vsel %vm771_vm10, 1, %v1822_v2 }
  0xdb   : > { %v279_v62 = vpop.permute.xlu1 %278  ;;  %v275_v63 = vpop.permute.xlu0 %274  ;;  %v657_v47 = vsub.s32 7, %v1970_v3 }
  0xdc   : > { %v1289_v0 = vadd.s32 %v1247_v57, %v1026_v59  ;;  %v1296_v4 = vadd.s32 %v1254_v58, %v1027_v60  ;;  %vm776_vm11 = vcmp.le.f32.partialorder %v279_v62, %v1989_v16  ;;  %vm777_vm12 = vcmp.le.f32.partialorder %v279_v62, %v1991_v17 }
  0xdd   : > { %v1032_v5 = vsel %vm776_vm11, 1, %v1822_v2  ;;  %v1033_v6 = vsel %vm777_vm12, 1, %v1822_v2  ;;  %vm774_vm13 = vcmp.le.f32.partialorder %v275_v63, %v1989_v16  ;;  %vm775_vm14 = vcmp.le.f32.partialorder %v275_v63, %v1991_v17  ;;  %534 = vbcast.lane.b32.xlu1 %v2073_v40, 272  ;;  %530 = vbcast.lane.b32.xlu0 %v2073_v40, 264 }
  0xde   : > { %v1275_v8 = vadd.s32 %v1289_v0, %v1032_v5  ;;  %v1282_v9 = vadd.s32 %v1296_v4, %v1033_v6  ;;  %v1030_v10 = vsel %vm774_vm13, 1, %v1822_v2  ;;  %v1031_v11 = vsel %vm775_vm14, 1, %v1822_v2 }
  0xdf   : > { %v287_v13 = vpop.permute.xlu1 %286  ;;  %v283_v14 = vpop.permute.xlu0 %282  ;;  %v2151_v58 = vrot.slane %v1973_v7, %v657_v47 }
  0xe0   : > { %v1317_v15 = vadd.s32 %v1275_v8, %v1030_v10  ;;  %v1324_v18 = vadd.s32 %v1282_v9, %v1031_v11  ;;  %vm780_vm15 = vcmp.le.f32.partialorder %v287_v13, %v1989_v16  ;;  %vm781_vm1 = vcmp.le.f32.partialorder %v287_v13, %v1991_v17 }
  0xe1   : > { %v1036_v19 = vsel %vm780_vm15, 1, %v1822_v2  ;;  %v1037_v20 = vsel %vm781_vm1, 1, %v1822_v2  ;;  %vm778_vm2 = vcmp.le.f32.partialorder %v283_v14, %v1989_v16  ;;  %vm779_vm3 = vcmp.le.f32.partialorder %v283_v14, %v1991_v17  ;;  %542 = vbcast.lane.b32.xlu1 %v2073_v40, 288  ;;  %538 = vbcast.lane.b32.xlu0 %v2073_v40, 280 }
  0xe2   : > { %v1303_v21 = vadd.s32 %v1317_v15, %v1036_v19  ;;  %v1310_v22 = vadd.s32 %v1324_v18, %v1037_v20  ;;  %v1034_v23 = vsel %vm778_vm2, 1, %v1822_v2  ;;  %v1035_v24 = vsel %vm779_vm3, 1, %v1822_v2 }
  0xe3   : > { %v295_v25 = vpop.permute.xlu1 %294  ;;  %v291_v26 = vpop.permute.xlu0 %290 }
  0xe4   : > { %v1345_v27 = vadd.s32 %v1303_v21, %v1034_v23  ;;  %v1352_v28 = vadd.s32 %v1310_v22, %v1035_v24  ;;  %vm784_vm4 = vcmp.le.f32.partialorder %v295_v25, %v1989_v16  ;;  %vm785_vm5 = vcmp.le.f32.partialorder %v295_v25, %v1991_v17 }
  0xe5   : > { %v1040_v29 = vsel %vm784_vm4, 1, %v1822_v2  ;;  %v1041_v30 = vsel %vm785_vm5, 1, %v1822_v2  ;;  %vm782_vm6 = vcmp.le.f32.partialorder %v291_v26, %v1989_v16  ;;  %vm783_vm7 = vcmp.le.f32.partialorder %v291_v26, %v1991_v17  ;;  %593 = vbcast.lane.b32.xlu1 %v2107_v12, 256  ;;  %546 = vbcast.lane.b32.xlu0 %v2073_v40, 296 }
  0xe6   : > { %v1331_v31 = vadd.s32 %v1345_v27, %v1040_v29  ;;  %v1338_v32 = vadd.s32 %v1352_v28, %v1041_v30  ;;  %v1038_v33 = vsel %vm782_vm6, 1, %v1822_v2  ;;  %v1039_v34 = vsel %vm783_vm7, 1, %v1822_v2 }
  0xe7   : > { %v303_v36 = vpop.permute.xlu1 %302  ;;  %v299_v37 = vpop.permute.xlu0 %298 }
  0xe8   : > { %v1373_v38 = vadd.s32 %v1331_v31, %v1038_v33  ;;  %v1380_v39 = vadd.s32 %v1338_v32, %v1039_v34  ;;  %vm788_vm8 = vcmp.le.f32.partialorder %v303_v36, %v1989_v16  ;;  %vm789_vm9 = vcmp.le.f32.partialorder %v303_v36, %v1991_v17 }
  0xe9   : > { %v1044_v41 = vsel %vm788_vm8, 1, %v1822_v2  ;;  %v1045_v42 = vsel %vm789_vm9, 1, %v1822_v2  ;;  %vm786_vm10 = vcmp.le.f32.partialorder %v299_v37, %v1989_v16  ;;  %vm787_vm11 = vcmp.le.f32.partialorder %v299_v37, %v1991_v17  ;;  %601 = vbcast.lane.b32.xlu1 %v2107_v12, 272  ;;  %597 = vbcast.lane.b32.xlu0 %v2107_v12, 264 }
  0xea   : > { %v1359_v43 = vadd.s32 %v1373_v38, %v1044_v41  ;;  %v1366_v44 = vadd.s32 %v1380_v39, %v1045_v42  ;;  %v1042_v45 = vsel %vm786_vm10, 1, %v1822_v2  ;;  %v1043_v46 = vsel %vm787_vm11, 1, %v1822_v2 }
  0xeb   : > { %v311_v48 = vpop.permute.xlu1 %310  ;;  %v307_v49 = vpop.permute.xlu0 %306 }
  0xec   : > { %v1401_v50 = vadd.s32 %v1359_v43, %v1042_v45  ;;  %v1408_v51 = vadd.s32 %v1366_v44, %v1043_v46  ;;  %vm792_vm12 = vcmp.le.f32.partialorder %v311_v48, %v1989_v16  ;;  %vm793_vm13 = vcmp.le.f32.partialorder %v311_v48, %v1991_v17 }
  0xed   : > { %v1048_v52 = vsel %vm792_vm12, 1, %v1822_v2  ;;  %v1049_v53 = vsel %vm793_vm13, 1, %v1822_v2  ;;  %vm790_vm14 = vcmp.le.f32.partialorder %v307_v49, %v1989_v16  ;;  %vm791_vm15 = vcmp.le.f32.partialorder %v307_v49, %v1991_v17  ;;  %550 = vbcast.lane.b32.xlu1 %v2073_v40, 304  ;;  %605 = vbcast.lane.b32.xlu0 %v2107_v12, 280 }
  0xee   : > { %v1387_v54 = vadd.s32 %v1401_v50, %v1048_v52  ;;  %v1394_v55 = vadd.s32 %v1408_v51, %v1049_v53  ;;  %v1046_v56 = vsel %vm790_vm14, 1, %v1822_v2  ;;  %v1047_v57 = vsel %vm791_vm15, 1, %v1822_v2 }
  0xef   : > { %v319_v59 = vpop.permute.xlu1 %318  ;;  %v315_v60 = vpop.permute.xlu0 %314 }
  0xf0   : > { %v1429_v61 = vadd.s32 %v1387_v54, %v1046_v56  ;;  %v1436_v62 = vadd.s32 %v1394_v55, %v1047_v57  ;;  %vm796_vm1 = vcmp.le.f32.partialorder %v319_v59, %v1989_v16  ;;  %vm797_vm2 = vcmp.le.f32.partialorder %v319_v59, %v1991_v17 }
  0xf1   : > { %v1052_v63 = vsel %vm796_vm1, 1, %v1822_v2  ;;  %v1053_v0 = vsel %vm797_vm2, 1, %v1822_v2  ;;  %vm794_vm3 = vcmp.le.f32.partialorder %v315_v60, %v1989_v16  ;;  %vm795_vm4 = vcmp.le.f32.partialorder %v315_v60, %v1991_v17  ;;  %609 = vbcast.lane.b32.xlu1 %v2107_v12, 288  ;;  %554 = vbcast.lane.b32.xlu0 %v2073_v40, 312 }
  0xf2   : > { %v1415_v7 = vadd.s32 %v1429_v61, %v1052_v63  ;;  %v1422_v4 = vadd.s32 %v1436_v62, %v1053_v0  ;;  %v1050_v5 = vsel %vm794_vm3, 1, %v1822_v2  ;;  %v1051_v6 = vsel %vm795_vm4, 1, %v1822_v2 }
  0xf3   : > { %v330_v8 = vpop.permute.xlu1 %329  ;;  %v326_v9 = vpop.permute.xlu0 %325 }
  0xf4   : > { %v1457_v10 = vadd.s32 %v1415_v7, %v1050_v5  ;;  %v1464_v11 = vadd.s32 %v1422_v4, %v1051_v6  ;;  %vm800_vm5 = vcmp.le.f32.partialorder %v330_v8, %v1989_v16  ;;  %vm801_vm6 = vcmp.le.f32.partialorder %v330_v8, %v1991_v17 }
  0xf5   : > { %v1056_v13 = vsel %vm800_vm5, 1, %v1822_v2  ;;  %v1057_v14 = vsel %vm801_vm6, 1, %v1822_v2  ;;  %vm798_vm7 = vcmp.le.f32.partialorder %v326_v9, %v1989_v16  ;;  %vm799_vm8 = vcmp.le.f32.partialorder %v326_v9, %v1991_v17  ;;  %660 = vbcast.lane.b32.xlu1 %v2151_v58, 256  ;;  %613 = vbcast.lane.b32.xlu0 %v2107_v12, 296 }
  0xf6   : > { %v1443_v15 = vadd.s32 %v1457_v10, %v1056_v13  ;;  %v1450_v18 = vadd.s32 %v1464_v11, %v1057_v14  ;;  %v1054_v19 = vsel %vm798_vm7, 1, %v1822_v2  ;;  %v1055_v20 = vsel %vm799_vm8, 1, %v1822_v2 }
  0xf7   : > { %v338_v21 = vpop.permute.xlu1 %337  ;;  %v334_v22 = vpop.permute.xlu0 %333 }
  0xf8   : > { %v1262_v23 = vadd.s32 %v1443_v15, %v1054_v19  ;;  %v1269_v24 = vadd.s32 %v1450_v18, %v1055_v20  ;;  %vm804_vm9 = vcmp.le.f32.partialorder %v338_v21, %v1989_v16  ;;  %vm805_vm10 = vcmp.le.f32.partialorder %v338_v21, %v1991_v17 }
  0xf9   : > { %v1060_v25 = vsel %vm804_vm9, 1, %v1822_v2  ;;  %v1061_v26 = vsel %vm805_vm10, 1, %v1822_v2  ;;  %vm802_vm11 = vcmp.le.f32.partialorder %v334_v22, %v1989_v16  ;;  %vm803_vm12 = vcmp.le.f32.partialorder %v334_v22, %v1991_v17  ;;  %668 = vbcast.lane.b32.xlu1 %v2151_v58, 272  ;;  %664 = vbcast.lane.b32.xlu0 %v2151_v58, 264 }
  0xfa   : > { %v1248_v27 = vadd.s32 %v1262_v23, %v1060_v25  ;;  %v1255_v28 = vadd.s32 %v1269_v24, %v1061_v26  ;;  %v1058_v29 = vsel %vm802_vm11, 1, %v1822_v2  ;;  %v1059_v30 = vsel %vm803_vm12, 1, %v1822_v2 }
  0xfb   : > { %v346_v31 = vpop.permute.xlu1 %345  ;;  %v342_v32 = vpop.permute.xlu0 %341 }
  0xfc   : > { %v1290_v33 = vadd.s32 %v1248_v27, %v1058_v29  ;;  %v1297_v34 = vadd.s32 %v1255_v28, %v1059_v30  ;;  %vm808_vm13 = vcmp.le.f32.partialorder %v346_v31, %v1989_v16  ;;  %vm809_vm14 = vcmp.le.f32.partialorder %v346_v31, %v1991_v17 }
  0xfd   : > { %v1064_v36 = vsel %vm808_vm13, 1, %v1822_v2  ;;  %v1065_v37 = vsel %vm809_vm14, 1, %v1822_v2  ;;  %vm806_vm15 = vcmp.le.f32.partialorder %v342_v32, %v1989_v16  ;;  %vm807_vm1 = vcmp.le.f32.partialorder %v342_v32, %v1991_v17  ;;  %558 = vbcast.lane.b32.xlu1 %v2073_v40, 320  ;;  %672 = vbcast.lane.b32.xlu0 %v2151_v58, 280 }
  0xfe   : > { %v1276_v38 = vadd.s32 %v1290_v33, %v1064_v36  ;;  %v1283_v39 = vadd.s32 %v1297_v34, %v1065_v37  ;;  %v1062_v41 = vsel %vm806_vm15, 1, %v1822_v2  ;;  %v1063_v42 = vsel %vm807_vm1, 1, %v1822_v2 }
  0xff   : > { %v354_v43 = vpop.permute.xlu1 %353  ;;  %v350_v44 = vpop.permute.xlu0 %349 }
 0x100   : > { %v1318_v45 = vadd.s32 %v1276_v38, %v1062_v41  ;;  %v1325_v46 = vadd.s32 %v1283_v39, %v1063_v42  ;;  %vm812_vm2 = vcmp.le.f32.partialorder %v354_v43, %v1989_v16  ;;  %vm813_vm3 = vcmp.le.f32.partialorder %v354_v43, %v1991_v17 }
 0x101   : > { %v1068_v47 = vsel %vm812_vm2, 1, %v1822_v2  ;;  %v1069_v48 = vsel %vm813_vm3, 1, %v1822_v2  ;;  %vm810_vm4 = vcmp.le.f32.partialorder %v350_v44, %v1989_v16  ;;  %vm811_vm5 = vcmp.le.f32.partialorder %v350_v44, %v1991_v17  ;;  %617 = vbcast.lane.b32.xlu1 %v2107_v12, 304  ;;  %562 = vbcast.lane.b32.xlu0 %v2073_v40, 328 }
 0x102   : > { %v1304_v49 = vadd.s32 %v1318_v45, %v1068_v47  ;;  %v1311_v50 = vadd.s32 %v1325_v46, %v1069_v48  ;;  %v1066_v51 = vsel %vm810_vm4, 1, %v1822_v2  ;;  %v1067_v52 = vsel %vm811_vm5, 1, %v1822_v2 }
 0x103   : > { %v362_v53 = vpop.permute.xlu1 %361  ;;  %v358_v54 = vpop.permute.xlu0 %357 }
 0x104   : > { %v1346_v55 = vadd.s32 %v1304_v49, %v1066_v51  ;;  %v1353_v56 = vadd.s32 %v1311_v50, %v1067_v52  ;;  %vm816_vm6 = vcmp.le.f32.partialorder %v362_v53, %v1989_v16  ;;  %vm817_vm7 = vcmp.le.f32.partialorder %v362_v53, %v1991_v17 }
 0x105   : > { %v1072_v57 = vsel %vm816_vm6, 1, %v1822_v2  ;;  %v1073_v59 = vsel %vm817_vm7, 1, %v1822_v2  ;;  %vm814_vm8 = vcmp.le.f32.partialorder %v358_v54, %v1989_v16  ;;  %vm815_vm9 = vcmp.le.f32.partialorder %v358_v54, %v1991_v17  ;;  %676 = vbcast.lane.b32.xlu1 %v2151_v58, 288  ;;  %621 = vbcast.lane.b32.xlu0 %v2107_v12, 312 }
 0x106   : > { %v1332_v60 = vadd.s32 %v1346_v55, %v1072_v57  ;;  %v1339_v61 = vadd.s32 %v1353_v56, %v1073_v59  ;;  %v1070_v62 = vsel %vm814_vm8, 1, %v1822_v2  ;;  %v1071_v63 = vsel %vm815_vm9, 1, %v1822_v2 }
 0x107   : > { %v370_v0 = vpop.permute.xlu1 %369  ;;  %v366_v7 = vpop.permute.xlu0 %365 }
 0x108   : > { %v1374_v4 = vadd.s32 %v1332_v60, %v1070_v62  ;;  %v1381_v5 = vadd.s32 %v1339_v61, %v1071_v63  ;;  %vm820_vm10 = vcmp.le.f32.partialorder %v370_v0, %v1989_v16  ;;  %vm821_vm11 = vcmp.le.f32.partialorder %v370_v0, %v1991_v17 }
 0x109   : > { %v1076_v6 = vsel %vm820_vm10, 1, %v1822_v2  ;;  %v1077_v8 = vsel %vm821_vm11, 1, %v1822_v2  ;;  %vm818_vm12 = vcmp.le.f32.partialorder %v366_v7, %v1989_v16  ;;  %vm819_vm13 = vcmp.le.f32.partialorder %v366_v7, %v1991_v17  ;;  %511 = vbcast.lane.b32.xlu1 %v2011_v35, 360  ;;  %680 = vbcast.lane.b32.xlu0 %v2151_v58, 296 }
 0x10a   : > { %v1360_v9 = vadd.s32 %v1374_v4, %v1076_v6  ;;  %v1367_v10 = vadd.s32 %v1381_v5, %v1077_v8  ;;  %v1074_v11 = vsel %vm818_vm12, 1, %v1822_v2  ;;  %v1075_v13 = vsel %vm819_vm13, 1, %v1822_v2 }
 0x10b   : > { %v378_v14 = vpop.permute.xlu1 %377  ;;  %v374_v15 = vpop.permute.xlu0 %373 }
 0x10c   : > { %v1402_v18 = vadd.s32 %v1360_v9, %v1074_v11  ;;  %v1409_v19 = vadd.s32 %v1367_v10, %v1075_v13  ;;  %vm824_vm14 = vcmp.le.f32.partialorder %v378_v14, %v1989_v16  ;;  %vm825_vm15 = vcmp.le.f32.partialorder %v378_v14, %v1991_v17 }
 0x10d   : > { %v1080_v20 = vsel %vm824_vm14, 1, %v1822_v2  ;;  %v1081_v21 = vsel %vm825_vm15, 1, %v1822_v2  ;;  %vm822_vm1 = vcmp.le.f32.partialorder %v374_v15, %v1989_v16  ;;  %vm823_vm2 = vcmp.le.f32.partialorder %v374_v15, %v1991_v17  ;;  %570 = vbcast.lane.b32.xlu1 %v2073_v40, 344  ;;  %566 = vbcast.lane.b32.xlu0 %v2073_v40, 336 }
 0x10e   : > { %v1388_v22 = vadd.s32 %v1402_v18, %v1080_v20  ;;  %v1395_v23 = vadd.s32 %v1409_v19, %v1081_v21  ;;  %v1078_v24 = vsel %vm822_vm1, 1, %v1822_v2  ;;  %v1079_v25 = vsel %vm823_vm2, 1, %v1822_v2 }
 0x10f   : > { %v386_v26 = vpop.permute.xlu1 %385  ;;  %v382_v27 = vpop.permute.xlu0 %381 }
 0x110   : > { %v1430_v28 = vadd.s32 %v1388_v22, %v1078_v24  ;;  %v1437_v29 = vadd.s32 %v1395_v23, %v1079_v25  ;;  %vm828_vm3 = vcmp.le.f32.partialorder %v386_v26, %v1989_v16  ;;  %vm829_vm4 = vcmp.le.f32.partialorder %v386_v26, %v1991_v17 }
 0x111   : > { %v1084_v30 = vsel %vm828_vm3, 1, %v1822_v2  ;;  %v1085_v31 = vsel %vm829_vm4, 1, %v1822_v2  ;;  %vm826_vm5 = vcmp.le.f32.partialorder %v382_v27, %v1989_v16  ;;  %vm827_vm6 = vcmp.le.f32.partialorder %v382_v27, %v1991_v17  ;;  %629 = vbcast.lane.b32.xlu1 %v2107_v12, 328  ;;  %625 = vbcast.lane.b32.xlu0 %v2107_v12, 320 }
 0x112   : > { %v1416_v32 = vadd.s32 %v1430_v28, %v1084_v30  ;;  %v1423_v33 = vadd.s32 %v1437_v29, %v1085_v31  ;;  %v1082_v34 = vsel %vm826_vm5, 1, %v1822_v2  ;;  %v1083_v36 = vsel %vm827_vm6, 1, %v1822_v2 }
 0x113   : > { %v397_v37 = vpop.permute.xlu1 %396  ;;  %v393_v38 = vpop.permute.xlu0 %392 }
 0x114   : > { %v1458_v39 = vadd.s32 %v1416_v32, %v1082_v34  ;;  %v1465_v41 = vadd.s32 %v1423_v33, %v1083_v36  ;;  %vm832_vm7 = vcmp.le.f32.partialorder %v397_v37, %v1989_v16  ;;  %vm833_vm8 = vcmp.le.f32.partialorder %v397_v37, %v1991_v17 }
 0x115   : > { %v1088_v42 = vsel %vm832_vm7, 1, %v1822_v2  ;;  %v1089_v43 = vsel %vm833_vm8, 1, %v1822_v2  ;;  %vm830_vm9 = vcmp.le.f32.partialorder %v393_v38, %v1989_v16  ;;  %vm831_vm10 = vcmp.le.f32.partialorder %v393_v38, %v1991_v17  ;;  %688 = vbcast.lane.b32.xlu1 %v2151_v58, 312  ;;  %684 = vbcast.lane.b32.xlu0 %v2151_v58, 304 }
 0x116   : > { %v1444_v44 = vadd.s32 %v1458_v39, %v1088_v42  ;;  %v1451_v45 = vadd.s32 %v1465_v41, %v1089_v43  ;;  %v1086_v46 = vsel %vm830_vm9, 1, %v1822_v2  ;;  %v1087_v47 = vsel %vm831_vm10, 1, %v1822_v2 }
 0x117   : > { %v405_v48 = vpop.permute.xlu1 %404  ;;  %v401_v49 = vpop.permute.xlu0 %400 }
 0x118   : > { %v1263_v50 = vadd.s32 %v1444_v44, %v1086_v46  ;;  %v1270_v51 = vadd.s32 %v1451_v45, %v1087_v47  ;;  %vm836_vm11 = vcmp.le.f32.partialorder %v405_v48, %v1989_v16  ;;  %vm837_vm12 = vcmp.le.f32.partialorder %v405_v48, %v1991_v17 }
 0x119   : > { %v1092_v52 = vsel %vm836_vm11, 1, %v1822_v2  ;;  %v1093_v53 = vsel %vm837_vm12, 1, %v1822_v2  ;;  %vm834_vm13 = vcmp.le.f32.partialorder %v401_v49, %v1989_v16  ;;  %vm835_vm14 = vcmp.le.f32.partialorder %v401_v49, %v1991_v17  ;;  %519 = vbcast.lane.b32.xlu1 %v2011_v35, 376  ;;  %515 = vbcast.lane.b32.xlu0 %v2011_v35, 368 }
 0x11a   : > { %v1249_v54 = vadd.s32 %v1263_v50, %v1092_v52  ;;  %v1256_v55 = vadd.s32 %v1270_v51, %v1093_v53  ;;  %v1090_v56 = vsel %vm834_vm13, 1, %v1822_v2  ;;  %v1091_v57 = vsel %vm835_vm14, 1, %v1822_v2 }
 0x11b   : > { %v413_v59 = vpop.permute.xlu1 %412  ;;  %v409_v60 = vpop.permute.xlu0 %408 }
 0x11c   : > { %v1291_v61 = vadd.s32 %v1249_v54, %v1090_v56  ;;  %v1298_v62 = vadd.s32 %v1256_v55, %v1091_v57  ;;  %vm840_vm15 = vcmp.le.f32.partialorder %v413_v59, %v1989_v16  ;;  %vm841_vm1 = vcmp.le.f32.partialorder %v413_v59, %v1991_v17 }
 0x11d   : > { %v1096_v63 = vsel %vm840_vm15, 1, %v1822_v2  ;;  %v1097_v0 = vsel %vm841_vm1, 1, %v1822_v2  ;;  %vm838_vm2 = vcmp.le.f32.partialorder %v409_v60, %v1989_v16  ;;  %vm839_vm3 = vcmp.le.f32.partialorder %v409_v60, %v1991_v17  ;;  %578 = vbcast.lane.b32.xlu1 %v2073_v40, 360  ;;  %574 = vbcast.lane.b32.xlu0 %v2073_v40, 352 }
 0x11e   : > { %v1277_v35 = vadd.s32 %v1291_v61, %v1096_v63  ;;  %v1284_v7 = vadd.s32 %v1298_v62, %v1097_v0  ;;  %v1094_v4 = vsel %vm838_vm2, 1, %v1822_v2  ;;  %v1095_v5 = vsel %vm839_vm3, 1, %v1822_v2 }
 0x11f   : > { %v421_v6 = vpop.permute.xlu1 %420  ;;  %v417_v8 = vpop.permute.xlu0 %416 }
 0x120   : > { %v1319_v9 = vadd.s32 %v1277_v35, %v1094_v4  ;;  %v1326_v10 = vadd.s32 %v1284_v7, %v1095_v5  ;;  %vm844_vm4 = vcmp.le.f32.partialorder %v421_v6, %v1989_v16  ;;  %vm845_vm5 = vcmp.le.f32.partialorder %v421_v6, %v1991_v17 }
 0x121   : > { %v1100_v11 = vsel %vm844_vm4, 1, %v1822_v2  ;;  %v1101_v13 = vsel %vm845_vm5, 1, %v1822_v2  ;;  %vm842_vm6 = vcmp.le.f32.partialorder %v417_v8, %v1989_v16  ;;  %vm843_vm7 = vcmp.le.f32.partialorder %v417_v8, %v1991_v17  ;;  %637 = vbcast.lane.b32.xlu1 %v2107_v12, 344  ;;  %633 = vbcast.lane.b32.xlu0 %v2107_v12, 336 }
 0x122   : > { %v1305_v14 = vadd.s32 %v1319_v9, %v1100_v11  ;;  %v1312_v15 = vadd.s32 %v1326_v10, %v1101_v13  ;;  %v1098_v18 = vsel %vm842_vm6, 1, %v1822_v2  ;;  %v1099_v19 = vsel %vm843_vm7, 1, %v1822_v2 }
 0x123   : > { %v429_v20 = vpop.permute.xlu1 %428  ;;  %v425_v21 = vpop.permute.xlu0 %424 }
 0x124   : > { %v1347_v22 = vadd.s32 %v1305_v14, %v1098_v18  ;;  %v1354_v23 = vadd.s32 %v1312_v15, %v1099_v19  ;;  %vm848_vm8 = vcmp.le.f32.partialorder %v429_v20, %v1989_v16  ;;  %vm849_vm9 = vcmp.le.f32.partialorder %v429_v20, %v1991_v17 }
 0x125   : > { %v1104_v24 = vsel %vm848_vm8, 1, %v1822_v2  ;;  %v1105_v25 = vsel %vm849_vm9, 1, %v1822_v2  ;;  %vm846_vm10 = vcmp.le.f32.partialorder %v425_v21, %v1989_v16  ;;  %vm847_vm11 = vcmp.le.f32.partialorder %v425_v21, %v1991_v17  ;;  %696 = vbcast.lane.b32.xlu1 %v2151_v58, 328  ;;  %692 = vbcast.lane.b32.xlu0 %v2151_v58, 320 }
 0x126   : > { %v1333_v26 = vadd.s32 %v1347_v22, %v1104_v24  ;;  %v1340_v27 = vadd.s32 %v1354_v23, %v1105_v25  ;;  %v1102_v28 = vsel %vm846_vm10, 1, %v1822_v2  ;;  %v1103_v29 = vsel %vm847_vm11, 1, %v1822_v2 }
 0x127   : > { %v437_v30 = vpop.permute.xlu1 %436  ;;  %v433_v31 = vpop.permute.xlu0 %432 }
 0x128   : > { %v1375_v32 = vadd.s32 %v1333_v26, %v1102_v28  ;;  %v1382_v33 = vadd.s32 %v1340_v27, %v1103_v29  ;;  %vm852_vm12 = vcmp.le.f32.partialorder %v437_v30, %v1989_v16  ;;  %vm853_vm13 = vcmp.le.f32.partialorder %v437_v30, %v1991_v17 }
 0x129   : > { %v1108_v34 = vsel %vm852_vm12, 1, %v1822_v2  ;;  %v1109_v36 = vsel %vm853_vm13, 1, %v1822_v2  ;;  %vm850_vm14 = vcmp.le.f32.partialorder %v433_v31, %v1989_v16  ;;  %vm851_vm15 = vcmp.le.f32.partialorder %v433_v31, %v1991_v17  ;;  %586 = vbcast.lane.b32.xlu1 %v2073_v40, 376  ;;  %582 = vbcast.lane.b32.xlu0 %v2073_v40, 368 }
 0x12a   : > { %v1361_v37 = vadd.s32 %v1375_v32, %v1108_v34  ;;  %v1368_v38 = vadd.s32 %v1382_v33, %v1109_v36  ;;  %v1106_v39 = vsel %vm850_vm14, 1, %v1822_v2  ;;  %v1107_v41 = vsel %vm851_vm15, 1, %v1822_v2 }
 0x12b   : > { %v445_v42 = vpop.permute.xlu1 %444  ;;  %v441_v43 = vpop.permute.xlu0 %440 }
 0x12c   : > { %v1403_v44 = vadd.s32 %v1361_v37, %v1106_v39  ;;  %v1410_v45 = vadd.s32 %v1368_v38, %v1107_v41  ;;  %vm856_vm1 = vcmp.le.f32.partialorder %v445_v42, %v1989_v16  ;;  %vm857_vm2 = vcmp.le.f32.partialorder %v445_v42, %v1991_v17 }
 0x12d   : > { %v1112_v46 = vsel %vm856_vm1, 1, %v1822_v2  ;;  %v1113_v47 = vsel %vm857_vm2, 1, %v1822_v2  ;;  %vm854_vm3 = vcmp.le.f32.partialorder %v441_v43, %v1989_v16  ;;  %vm855_vm4 = vcmp.le.f32.partialorder %v441_v43, %v1991_v17  ;;  %645 = vbcast.lane.b32.xlu1 %v2107_v12, 360  ;;  %641 = vbcast.lane.b32.xlu0 %v2107_v12, 352 }
 0x12e   : > { %v1389_v40 = vadd.s32 %v1403_v44, %v1112_v46  ;;  %v1396_v48 = vadd.s32 %v1410_v45, %v1113_v47  ;;  %v1110_v49 = vsel %vm854_vm3, 1, %v1822_v2  ;;  %v1111_v50 = vsel %vm855_vm4, 1, %v1822_v2 }
 0x12f   : > { %v453_v51 = vpop.permute.xlu1 %452  ;;  %v449_v52 = vpop.permute.xlu0 %448 }
 0x130   : > { %v1250_v53 = vadd.s32 %v1389_v40, %v1110_v49  ;;  %v1257_v54 = vadd.s32 %v1396_v48, %v1111_v50  ;;  %vm860_vm5 = vcmp.le.f32.partialorder %v453_v51, %v1989_v16  ;;  %vm861_vm6 = vcmp.le.f32.partialorder %v453_v51, %v1991_v17 }
 0x131   : > { %v1116_v55 = vsel %vm860_vm5, 1, %v1822_v2  ;;  %v1117_v56 = vsel %vm861_vm6, 1, %v1822_v2  ;;  %vm858_vm7 = vcmp.le.f32.partialorder %v449_v52, %v1989_v16  ;;  %vm859_vm8 = vcmp.le.f32.partialorder %v449_v52, %v1991_v17  ;;  %704 = vbcast.lane.b32.xlu1 %v2151_v58, 344  ;;  %700 = vbcast.lane.b32.xlu0 %v2151_v58, 336 }
 0x132   : > { %v1417_v57 = vadd.s32 %v1250_v53, %v1116_v55  ;;  %v1424_v59 = vadd.s32 %v1257_v54, %v1117_v56  ;;  %v1114_v60 = vsel %vm858_vm7, 1, %v1822_v2  ;;  %v1115_v61 = vsel %vm859_vm8, 1, %v1822_v2 }
 0x133   : > { %v464_v62 = vpop.permute.xlu1 %463  ;;  %v460_v63 = vpop.permute.xlu0 %459 }
 0x134   : > { %v1278_v0 = vadd.s32 %v1417_v57, %v1114_v60  ;;  %v1285_v35 = vadd.s32 %v1424_v59, %v1115_v61  ;;  %vm864_vm9 = vcmp.le.f32.partialorder %v464_v62, %v1989_v16  ;;  %vm865_vm10 = vcmp.le.f32.partialorder %v464_v62, %v1991_v17 }
 0x135   : > { %v1120_v7 = vsel %vm864_vm9, 1, %v1822_v2  ;;  %v1121_v4 = vsel %vm865_vm10, 1, %v1822_v2  ;;  %vm862_vm11 = vcmp.le.f32.partialorder %v460_v63, %v1989_v16  ;;  %vm863_vm12 = vcmp.le.f32.partialorder %v460_v63, %v1991_v17  ;;  %653 = vbcast.lane.b32.xlu1 %v2107_v12, 376  ;;  %649 = vbcast.lane.b32.xlu0 %v2107_v12, 368 }
 0x136   : > { %v1264_v5 = vadd.s32 %v1278_v0, %v1120_v7  ;;  %v1271_v6 = vadd.s32 %v1285_v35, %v1121_v4  ;;  %v1118_v8 = vsel %vm862_vm11, 1, %v1822_v2  ;;  %v1119_v9 = vsel %vm863_vm12, 1, %v1822_v2 }
 0x137   : > { %v472_v10 = vpop.permute.xlu1 %471  ;;  %v468_v11 = vpop.permute.xlu0 %467 }
 0x138   : > { %v1306_v13 = vadd.s32 %v1264_v5, %v1118_v8  ;;  %v1313_v14 = vadd.s32 %v1271_v6, %v1119_v9  ;;  %vm868_vm13 = vcmp.le.f32.partialorder %v472_v10, %v1989_v16  ;;  %vm869_vm14 = vcmp.le.f32.partialorder %v472_v10, %v1991_v17 }
 0x139   : > { %v1124_v15 = vsel %vm868_vm13, 1, %v1822_v2  ;;  %v1125_v18 = vsel %vm869_vm14, 1, %v1822_v2  ;;  %vm866_vm15 = vcmp.le.f32.partialorder %v468_v11, %v1989_v16  ;;  %vm867_vm1 = vcmp.le.f32.partialorder %v468_v11, %v1991_v17  ;;  %712 = vbcast.lane.b32.xlu1 %v2151_v58, 360  ;;  %708 = vbcast.lane.b32.xlu0 %v2151_v58, 352 }
 0x13a   : > { %v1292_v12 = vadd.s32 %v1306_v13, %v1124_v15  ;;  %v1299_v19 = vadd.s32 %v1313_v14, %v1125_v18  ;;  %v1122_v20 = vsel %vm866_vm15, 1, %v1822_v2  ;;  %v1123_v21 = vsel %vm867_vm1, 1, %v1822_v2 }
 0x13b   : > { %v480_v22 = vpop.permute.xlu1 %479  ;;  %v476_v23 = vpop.permute.xlu0 %475 }
 0x13c   : > { %v1251_v24 = vadd.s32 %v1292_v12, %v1122_v20  ;;  %v1258_v25 = vadd.s32 %v1299_v19, %v1123_v21  ;;  %vm872_vm2 = vcmp.le.f32.partialorder %v480_v22, %v1989_v16  ;;  %vm873_vm3 = vcmp.le.f32.partialorder %v480_v22, %v1991_v17 }
 0x13d   : > { %v1128_v26 = vsel %vm872_vm2, 1, %v1822_v2  ;;  %v1129_v27 = vsel %vm873_vm3, 1, %v1822_v2  ;;  %vm870_vm4 = vcmp.le.f32.partialorder %v476_v23, %v1989_v16  ;;  %vm871_vm5 = vcmp.le.f32.partialorder %v476_v23, %v1991_v17  ;;  %720 = vbcast.lane.b32.xlu1 %v2151_v58, 376  ;;  %716 = vbcast.lane.b32.xlu0 %v2151_v58, 368 }
 0x13e   : > { %v1320_v28 = vadd.s32 %v1251_v24, %v1128_v26  ;;  %v1327_v29 = vadd.s32 %v1258_v25, %v1129_v27  ;;  %v1126_v30 = vsel %vm870_vm4, 1, %v1822_v2  ;;  %v1127_v31 = vsel %vm871_vm5, 1, %v1822_v2 }
 0x13f   : > { %v488_v32 = vpop.permute.xlu1 %487  ;;  %v484_v33 = vpop.permute.xlu0 %483 }
 0x140   : > { %v1279_v34 = vadd.s32 %v1320_v28, %v1126_v30  ;;  %v1286_v36 = vadd.s32 %v1327_v29, %v1127_v31  ;;  %vm876_vm6 = vcmp.le.f32.partialorder %v488_v32, %v1989_v16  ;;  %vm877_vm7 = vcmp.le.f32.partialorder %v488_v32, %v1991_v17 }
 0x141   : > { %v1132_v37 = vsel %vm876_vm6, 1, %v1822_v2  ;;  %v1133_v38 = vsel %vm877_vm7, 1, %v1822_v2  ;;  %vm874_vm8 = vcmp.le.f32.partialorder %v484_v33, %v1989_v16  ;;  %vm875_vm9 = vcmp.le.f32.partialorder %v484_v33, %v1991_v17 }
 0x142   : > { %v1265_v58 = vadd.s32 %v1279_v34, %v1132_v37  ;;  %v1272_v39 = vadd.s32 %v1286_v36, %v1133_v38  ;;  %v1130_v41 = vsel %vm874_vm8, 1, %v1822_v2  ;;  %v1131_v42 = vsel %vm875_vm9, 1, %v1822_v2 }
 0x143   : > { %v496_v43 = vpop.permute.xlu1 %495  ;;  %v492_v44 = vpop.permute.xlu0 %491 }
 0x144   : > { %v1334_v45 = vadd.s32 %v1265_v58, %v1130_v41  ;;  %v1341_v46 = vadd.s32 %v1272_v39, %v1131_v42  ;;  %vm880_vm10 = vcmp.le.f32.partialorder %v496_v43, %v1989_v16  ;;  %vm881_vm11 = vcmp.le.f32.partialorder %v496_v43, %v1991_v17 }
 0x145   : > { %v1136_v47 = vsel %vm880_vm10, 1, %v1822_v2  ;;  %v1137_v40 = vsel %vm881_vm11, 1, %v1822_v2  ;;  %vm878_vm12 = vcmp.le.f32.partialorder %v492_v44, %v1989_v16  ;;  %vm879_vm13 = vcmp.le.f32.partialorder %v492_v44, %v1991_v17 }
 0x146   : > { %v1293_v48 = vadd.s32 %v1334_v45, %v1136_v47  ;;  %v1300_v49 = vadd.s32 %v1341_v46, %v1137_v40  ;;  %v1134_v50 = vsel %vm878_vm12, 1, %v1822_v2  ;;  %v1135_v51 = vsel %vm879_vm13, 1, %v1822_v2 }
 0x147   : > { %v504_v52 = vpop.permute.xlu1 %503  ;;  %v500_v53 = vpop.permute.xlu0 %499 }
 0x148   : > { %v1307_v54 = vadd.s32 %v1293_v48, %v1134_v50  ;;  %v1314_v55 = vadd.s32 %v1300_v49, %v1135_v51  ;;  %vm884_vm14 = vcmp.le.f32.partialorder %v504_v52, %v1989_v16  ;;  %vm885_vm15 = vcmp.le.f32.partialorder %v504_v52, %v1991_v17 }
 0x149   : > { %v1140_v56 = vsel %vm884_vm14, 1, %v1822_v2  ;;  %v1141_v57 = vsel %vm885_vm15, 1, %v1822_v2  ;;  %vm882_vm1 = vcmp.le.f32.partialorder %v500_v53, %v1989_v16  ;;  %vm883_vm2 = vcmp.le.f32.partialorder %v500_v53, %v1991_v17 }
 0x14a   : > { %v1348_v59 = vadd.s32 %v1307_v54, %v1140_v56  ;;  %v1355_v60 = vadd.s32 %v1314_v55, %v1141_v57  ;;  %v1138_v61 = vsel %vm882_vm1, 1, %v1822_v2  ;;  %v1139_v62 = vsel %vm883_vm2, 1, %v1822_v2 }
 0x14b   : > { %v527_v63 = vpop.permute.xlu1 %526  ;;  %v508_v0 = vpop.permute.xlu0 %507 }
 0x14c   : > { %v1252_v35 = vadd.s32 %v1348_v59, %v1138_v61  ;;  %v1259_v7 = vadd.s32 %v1355_v60, %v1139_v62  ;;  %vm894_vm3 = vcmp.le.f32.partialorder %v527_v63, %v1989_v16  ;;  %vm895_vm4 = vcmp.le.f32.partialorder %v527_v63, %v1991_v17 }
 0x14d   : > { %v1150_v4 = vsel %vm894_vm3, 1, %v1822_v2  ;;  %v1151_v5 = vsel %vm895_vm4, 1, %v1822_v2  ;;  %vm886_vm5 = vcmp.le.f32.partialorder %v508_v0, %v1989_v16  ;;  %vm887_vm6 = vcmp.le.f32.partialorder %v508_v0, %v1991_v17 }
 0x14e   : > { %v1321_v6 = vadd.s32 %v1252_v35, %v1150_v4  ;;  %v1328_v8 = vadd.s32 %v1259_v7, %v1151_v5  ;;  %v1142_v9 = vsel %vm886_vm5, 1, %v1822_v2  ;;  %v1143_v10 = vsel %vm887_vm6, 1, %v1822_v2 }
 0x14f   : > { %v535_v11 = vpop.permute.xlu1 %534  ;;  %v531_v13 = vpop.permute.xlu0 %530 }
 0x150   : > { %v1280_v14 = vadd.s32 %v1321_v6, %v1142_v9  ;;  %v1287_v15 = vadd.s32 %v1328_v8, %v1143_v10  ;;  %vm898_vm7 = vcmp.le.f32.partialorder %v535_v11, %v1989_v16  ;;  %vm899_vm8 = vcmp.le.f32.partialorder %v535_v11, %v1991_v17 }
 0x151   : > { %v1154_v18 = vsel %vm898_vm7, 1, %v1822_v2  ;;  %v1155_v12 = vsel %vm899_vm8, 1, %v1822_v2  ;;  %vm896_vm9 = vcmp.le.f32.partialorder %v531_v13, %v1989_v16  ;;  %vm897_vm10 = vcmp.le.f32.partialorder %v531_v13, %v1991_v17 }
 0x152   : > { %v1471_v19 = vadd.s32 %v1280_v14, %v1154_v18  ;;  %v1492_v20 = vadd.s32 %v1287_v15, %v1155_v12  ;;  %v1152_v21 = vsel %vm896_vm9, 1, %v1822_v2  ;;  %v1153_v22 = vsel %vm897_vm10, 1, %v1822_v2 }
 0x153   : > { %v543_v23 = vpop.permute.xlu1 %542  ;;  %v539_v24 = vpop.permute.xlu0 %538 }
 0x154   : > { %v1266_v25 = vadd.s32 %v1471_v19, %v1152_v21  ;;  %v1273_v26 = vadd.s32 %v1492_v20, %v1153_v22  ;;  %vm902_vm11 = vcmp.le.f32.partialorder %v543_v23, %v1989_v16  ;;  %vm903_vm12 = vcmp.le.f32.partialorder %v543_v23, %v1991_v17 }
 0x155   : > { %v1158_v27 = vsel %vm902_vm11, 1, %v1822_v2  ;;  %v1159_v28 = vsel %vm903_vm12, 1, %v1822_v2  ;;  %vm900_vm13 = vcmp.le.f32.partialorder %v539_v24, %v1989_v16  ;;  %vm901_vm14 = vcmp.le.f32.partialorder %v539_v24, %v1991_v17 }
 0x156   : > { %v1362_v29 = vadd.s32 %v1266_v25, %v1158_v27  ;;  %v1369_v30 = vadd.s32 %v1273_v26, %v1159_v28  ;;  %v1156_v31 = vsel %vm900_vm13, 1, %v1822_v2  ;;  %v1157_v32 = vsel %vm901_vm14, 1, %v1822_v2 }
 0x157   : > { %v594_v33 = vpop.permute.xlu1 %593  ;;  %v547_v34 = vpop.permute.xlu0 %546 }
 0x158   : > { %v1294_v36 = vadd.s32 %v1362_v29, %v1156_v31  ;;  %v1301_v37 = vadd.s32 %v1369_v30, %v1157_v32  ;;  %vm926_vm15 = vcmp.le.f32.partialorder %v594_v33, %v1989_v16  ;;  %vm927_vm1 = vcmp.le.f32.partialorder %v594_v33, %v1991_v17 }
 0x159   : > { %v1182_v38 = vsel %vm926_vm15, 1, %v1822_v2  ;;  %v1183_v58 = vsel %vm927_vm1, 1, %v1822_v2  ;;  %vm904_vm2 = vcmp.le.f32.partialorder %v547_v34, %v1989_v16  ;;  %vm905_vm3 = vcmp.le.f32.partialorder %v547_v34, %v1991_v17 }
 0x15a   : > { %v1472_v39 = vadd.s32 %v1294_v36, %v1182_v38  ;;  %v1493_v41 = vadd.s32 %v1301_v37, %v1183_v58  ;;  %v1160_v42 = vsel %vm904_vm2, 1, %v1822_v2  ;;  %v1161_v43 = vsel %vm905_vm3, 1, %v1822_v2 }
 0x15b   : > { %v602_v44 = vpop.permute.xlu1 %601  ;;  %v598_v45 = vpop.permute.xlu0 %597 }
 0x15c   : > { %v1335_v46 = vadd.s32 %v1472_v39, %v1160_v42  ;;  %v1342_v47 = vadd.s32 %v1493_v41, %v1161_v43  ;;  %vm930_vm4 = vcmp.le.f32.partialorder %v602_v44, %v1989_v16  ;;  %vm931_vm5 = vcmp.le.f32.partialorder %v602_v44, %v1991_v17 }
 0x15d   : > { %v1186_v40 = vsel %vm930_vm4, 1, %v1822_v2  ;;  %v1187_v48 = vsel %vm931_vm5, 1, %v1822_v2  ;;  %vm928_vm6 = vcmp.le.f32.partialorder %v598_v45, %v1989_v16  ;;  %vm929_vm7 = vcmp.le.f32.partialorder %v598_v45, %v1991_v17 }
 0x15e   : > { %v1376_v49 = vadd.s32 %v1335_v46, %v1186_v40  ;;  %v1383_v50 = vadd.s32 %v1342_v47, %v1187_v48  ;;  %v1184_v51 = vsel %vm928_vm6, 1, %v1822_v2  ;;  %v1185_v52 = vsel %vm929_vm7, 1, %v1822_v2 }
 0x15f   : > { %v551_v53 = vpop.permute.xlu1 %550  ;;  %v606_v54 = vpop.permute.xlu0 %605 }
 0x160   : > { %v1308_v55 = vadd.s32 %v1376_v49, %v1184_v51  ;;  %v1315_v56 = vadd.s32 %v1383_v50, %v1185_v52  ;;  %vm906_vm8 = vcmp.le.f32.partialorder %v551_v53, %v1989_v16  ;;  %vm907_vm9 = vcmp.le.f32.partialorder %v551_v53, %v1991_v17 }
 0x161   : > { %v1162_v57 = vsel %vm906_vm8, 1, %v1822_v2  ;;  %v1163_v59 = vsel %vm907_vm9, 1, %v1822_v2  ;;  %vm932_vm10 = vcmp.le.f32.partialorder %v606_v54, %v1989_v16  ;;  %vm933_vm11 = vcmp.le.f32.partialorder %v606_v54, %v1991_v17 }
 0x162   : > { %v1473_v60 = vadd.s32 %v1308_v55, %v1162_v57  ;;  %v1494_v61 = vadd.s32 %v1315_v56, %v1163_v59  ;;  %v1188_v62 = vsel %vm932_vm10, 1, %v1822_v2  ;;  %v1189_v63 = vsel %vm933_vm11, 1, %v1822_v2 }
 0x163   : > { %v610_v0 = vpop.permute.xlu1 %609  ;;  %v555_v35 = vpop.permute.xlu0 %554 }
 0x164   : > { %v1349_v7 = vadd.s32 %v1473_v60, %v1188_v62  ;;  %v1356_v4 = vadd.s32 %v1494_v61, %v1189_v63  ;;  %vm934_vm12 = vcmp.le.f32.partialorder %v610_v0, %v1989_v16  ;;  %vm935_vm13 = vcmp.le.f32.partialorder %v610_v0, %v1991_v17 }
 0x165   : > { %v1190_v5 = vsel %vm934_vm12, 1, %v1822_v2  ;;  %v1191_v6 = vsel %vm935_vm13, 1, %v1822_v2  ;;  %vm908_vm14 = vcmp.le.f32.partialorder %v555_v35, %v1989_v16  ;;  %vm909_vm15 = vcmp.le.f32.partialorder %v555_v35, %v1991_v17 }
 0x166   : > { %v1431_v8 = vadd.s32 %v1349_v7, %v1190_v5  ;;  %v1438_v9 = vadd.s32 %v1356_v4, %v1191_v6  ;;  %v1164_v10 = vsel %vm908_vm14, 1, %v1822_v2  ;;  %v1165_v11 = vsel %vm909_vm15, 1, %v1822_v2 }
 0x167   : > { %v661_v13 = vpop.permute.xlu1 %660  ;;  %v614_v14 = vpop.permute.xlu0 %613 }
 0x168   : > { %v1322_v15 = vadd.s32 %v1431_v8, %v1164_v10  ;;  %v1329_v18 = vadd.s32 %v1438_v9, %v1165_v11  ;;  %vm958_vm1 = vcmp.le.f32.partialorder %v661_v13, %v1989_v16  ;;  %vm959_vm2 = vcmp.le.f32.partialorder %v661_v13, %v1991_v17 }
 0x169   : > { %v1214_v12 = vsel %vm958_vm1, 1, %v1822_v2  ;;  %v1215_v19 = vsel %vm959_vm2, 1, %v1822_v2  ;;  %vm936_vm3 = vcmp.le.f32.partialorder %v614_v14, %v1989_v16  ;;  %vm937_vm4 = vcmp.le.f32.partialorder %v614_v14, %v1991_v17 }
 0x16a   : > { %v1474_v20 = vadd.s32 %v1322_v15, %v1214_v12  ;;  %v1495_v21 = vadd.s32 %v1329_v18, %v1215_v19  ;;  %v1192_v22 = vsel %vm936_vm3, 1, %v1822_v2  ;;  %v1193_v23 = vsel %vm937_vm4, 1, %v1822_v2 }
 0x16b   : > { %v669_v24 = vpop.permute.xlu1 %668  ;;  %v665_v25 = vpop.permute.xlu0 %664 }
 0x16c   : > { %v1404_v26 = vadd.s32 %v1474_v20, %v1192_v22  ;;  %v1411_v27 = vadd.s32 %v1495_v21, %v1193_v23  ;;  %vm962_vm5 = vcmp.le.f32.partialorder %v669_v24, %v1989_v16  ;;  %vm963_vm6 = vcmp.le.f32.partialorder %v669_v24, %v1991_v17 }
 0x16d   : > { %v1218_v28 = vsel %vm962_vm5, 1, %v1822_v2  ;;  %v1219_v29 = vsel %vm963_vm6, 1, %v1822_v2  ;;  %vm960_vm7 = vcmp.le.f32.partialorder %v665_v25, %v1989_v16  ;;  %vm961_vm8 = vcmp.le.f32.partialorder %v665_v25, %v1991_v17 }
 0x16e   : > { %v1390_v30 = vadd.s32 %v1404_v26, %v1218_v28  ;;  %v1397_v31 = vadd.s32 %v1411_v27, %v1219_v29  ;;  %v1216_v32 = vsel %vm960_vm7, 1, %v1822_v2  ;;  %v1217_v33 = vsel %vm961_vm8, 1, %v1822_v2 }
 0x16f   : > { %v559_v34 = vpop.permute.xlu1 %558  ;;  %v673_v36 = vpop.permute.xlu0 %672 }
 0x170   : > { %v1377_v37 = vadd.s32 %v1390_v30, %v1216_v32  ;;  %v1384_v38 = vadd.s32 %v1397_v31, %v1217_v33  ;;  %vm910_vm9 = vcmp.le.f32.partialorder %v559_v34, %v1989_v16  ;;  %vm911_vm10 = vcmp.le.f32.partialorder %v559_v34, %v1991_v17 }
 0x171   : > { %v1166_v58 = vsel %vm910_vm9, 1, %v1822_v2  ;;  %v1167_v39 = vsel %vm911_vm10, 1, %v1822_v2  ;;  %vm964_vm11 = vcmp.le.f32.partialorder %v673_v36, %v1989_v16  ;;  %vm965_vm12 = vcmp.le.f32.partialorder %v673_v36, %v1991_v17 }
 0x172   : > { %v1363_v41 = vadd.s32 %v1377_v37, %v1166_v58  ;;  %v1370_v42 = vadd.s32 %v1384_v38, %v1167_v39  ;;  %v1220_v43 = vsel %vm964_vm11, 1, %v1822_v2  ;;  %v1221_v44 = vsel %vm965_vm12, 1, %v1822_v2 }
 0x173   : > { %v618_v45 = vpop.permute.xlu1 %617  ;;  %v563_v46 = vpop.permute.xlu0 %562 }
 0x174   : > { %v1350_v47 = vadd.s32 %v1363_v41, %v1220_v43  ;;  %v1357_v40 = vadd.s32 %v1370_v42, %v1221_v44  ;;  %vm938_vm13 = vcmp.le.f32.partialorder %v618_v45, %v1989_v16  ;;  %vm939_vm14 = vcmp.le.f32.partialorder %v618_v45, %v1991_v17 }
 0x175   : > { %v1194_v48 = vsel %vm938_vm13, 1, %v1822_v2  ;;  %v1195_v49 = vsel %vm939_vm14, 1, %v1822_v2  ;;  %vm912_vm15 = vcmp.le.f32.partialorder %v563_v46, %v1989_v16  ;;  %vm913_vm1 = vcmp.le.f32.partialorder %v563_v46, %v1991_v17 }
 0x176   : > { %v1476_v50 = vadd.s32 %v1350_v47, %v1194_v48  ;;  %v1497_v51 = vadd.s32 %v1357_v40, %v1195_v49  ;;  %v1168_v52 = vsel %vm912_vm15, 1, %v1822_v2  ;;  %v1169_v53 = vsel %vm913_vm1, 1, %v1822_v2 }
 0x177   : > { %v677_v54 = vpop.permute.xlu1 %676  ;;  %v622_v55 = vpop.permute.xlu0 %621 }
 0x178   : > { %v1336_v56 = vadd.s32 %v1476_v50, %v1168_v52  ;;  %v1343_v57 = vadd.s32 %v1497_v51, %v1169_v53  ;;  %vm966_vm2 = vcmp.le.f32.partialorder %v677_v54, %v1989_v16  ;;  %vm967_vm3 = vcmp.le.f32.partialorder %v677_v54, %v1991_v17 }
 0x179   : > { %v1222_v59 = vsel %vm966_vm2, 1, %v1822_v2  ;;  %v1223_v60 = vsel %vm967_vm3, 1, %v1822_v2  ;;  %vm940_vm4 = vcmp.le.f32.partialorder %v622_v55, %v1989_v16  ;;  %vm941_vm5 = vcmp.le.f32.partialorder %v622_v55, %v1991_v17 }
 0x17a   : > { %v1475_v61 = vadd.s32 %v1336_v56, %v1222_v59  ;;  %v1496_v62 = vadd.s32 %v1343_v57, %v1223_v60  ;;  %v1196_v63 = vsel %vm940_vm4, 1, %v1822_v2  ;;  %v1197_v0 = vsel %vm941_vm5, 1, %v1822_v2 }
 0x17b   : > { %v512_v35 = vpop.permute.xlu1 %511  ;;  %v681_v7 = vpop.permute.xlu0 %680 }
 0x17c   : > { %v1459_v4 = vadd.s32 %v1475_v61, %v1196_v63  ;;  %v1466_v5 = vadd.s32 %v1496_v62, %v1197_v0  ;;  %vm888_vm6 = vcmp.le.f32.partialorder %v512_v35, %v1989_v16  ;;  %vm889_vm7 = vcmp.le.f32.partialorder %v512_v35, %v1991_v17 }
 0x17d   : > { %v1144_v6 = vsel %vm888_vm6, 1, %v1822_v2  ;;  %v1145_v8 = vsel %vm889_vm7, 1, %v1822_v2  ;;  %vm968_vm8 = vcmp.le.f32.partialorder %v681_v7, %v1989_v16  ;;  %vm969_vm9 = vcmp.le.f32.partialorder %v681_v7, %v1991_v17 }
 0x17e   : > { %v1445_v9 = vadd.s32 %v1459_v4, %v1144_v6  ;;  %v1452_v10 = vadd.s32 %v1466_v5, %v1145_v8  ;;  %v1224_v11 = vsel %vm968_vm8, 1, %v1822_v2  ;;  %v1225_v13 = vsel %vm969_vm9, 1, %v1822_v2 }
 0x17f   : > { %v571_v14 = vpop.permute.xlu1 %570  ;;  %v567_v15 = vpop.permute.xlu0 %566 }
 0x180   : > { %v1432_v18 = vadd.s32 %v1445_v9, %v1224_v11  ;;  %v1439_v12 = vadd.s32 %v1452_v10, %v1225_v13  ;;  %vm916_vm10 = vcmp.le.f32.partialorder %v571_v14, %v1989_v16  ;;  %vm917_vm11 = vcmp.le.f32.partialorder %v571_v14, %v1991_v17 }
 0x181   : > { %v1172_v19 = vsel %vm916_vm10, 1, %v1822_v2  ;;  %v1173_v20 = vsel %vm917_vm11, 1, %v1822_v2  ;;  %vm914_vm12 = vcmp.le.f32.partialorder %v567_v15, %v1989_v16  ;;  %vm915_vm13 = vcmp.le.f32.partialorder %v567_v15, %v1991_v17 }
 0x182   : > { %v1418_v21 = vadd.s32 %v1432_v18, %v1172_v19  ;;  %v1425_v22 = vadd.s32 %v1439_v12, %v1173_v20  ;;  %v1170_v23 = vsel %vm914_vm12, 1, %v1822_v2  ;;  %v1171_v24 = vsel %vm915_vm13, 1, %v1822_v2 }
 0x183   : > { %v630_v25 = vpop.permute.xlu1 %629  ;;  %v626_v26 = vpop.permute.xlu0 %625 }
 0x184   : > { %v1405_v27 = vadd.s32 %v1418_v21, %v1170_v23  ;;  %v1412_v28 = vadd.s32 %v1425_v22, %v1171_v24  ;;  %vm944_vm14 = vcmp.le.f32.partialorder %v630_v25, %v1989_v16  ;;  %vm945_vm15 = vcmp.le.f32.partialorder %v630_v25, %v1991_v17 }
 0x185   : > { %v1200_v29 = vsel %vm944_vm14, 1, %v1822_v2  ;;  %v1201_v30 = vsel %vm945_vm15, 1, %v1822_v2  ;;  %vm942_vm1 = vcmp.le.f32.partialorder %v626_v26, %v1989_v16  ;;  %vm943_vm2 = vcmp.le.f32.partialorder %v626_v26, %v1991_v17 }
 0x186   : > { %v1391_v31 = vadd.s32 %v1405_v27, %v1200_v29  ;;  %v1398_v32 = vadd.s32 %v1412_v28, %v1201_v30  ;;  %v1198_v33 = vsel %vm942_vm1, 1, %v1822_v2  ;;  %v1199_v34 = vsel %vm943_vm2, 1, %v1822_v2 }
 0x187   : > { %v689_v36 = vpop.permute.xlu1 %688  ;;  %v685_v37 = vpop.permute.xlu0 %684 }
 0x188   : > { %v1378_v38 = vadd.s32 %v1391_v31, %v1198_v33  ;;  %v1385_v58 = vadd.s32 %v1398_v32, %v1199_v34  ;;  %vm972_vm3 = vcmp.le.f32.partialorder %v689_v36, %v1989_v16  ;;  %vm973_vm4 = vcmp.le.f32.partialorder %v689_v36, %v1991_v17 }
 0x189   : > { %v1228_v39 = vsel %vm972_vm3, 1, %v1822_v2  ;;  %v1229_v41 = vsel %vm973_vm4, 1, %v1822_v2  ;;  %vm970_vm5 = vcmp.le.f32.partialorder %v685_v37, %v1989_v16  ;;  %vm971_vm6 = vcmp.le.f32.partialorder %v685_v37, %v1991_v17 }
 0x18a   : > { %v1478_v42 = vadd.s32 %v1378_v38, %v1228_v39  ;;  %v1499_v43 = vadd.s32 %v1385_v58, %v1229_v41  ;;  %v1226_v44 = vsel %vm970_vm5, 1, %v1822_v2  ;;  %v1227_v45 = vsel %vm971_vm6, 1, %v1822_v2 }
 0x18b   : > { %v520_v46 = vpop.permute.xlu1 %519  ;;  %v516_v47 = vpop.permute.xlu0 %515 }
 0x18c   : > { %v1364_v40 = vadd.s32 %v1478_v42, %v1226_v44  ;;  %v1371_v48 = vadd.s32 %v1499_v43, %v1227_v45  ;;  %vm892_vm7 = vcmp.le.f32.partialorder %v520_v46, %v1989_v16  ;;  %vm893_vm8 = vcmp.le.f32.partialorder %v520_v46, %v1991_v17 }
 0x18d   : > { %v1148_v49 = vsel %vm892_vm7, 1, %v1822_v2  ;;  %v1149_v50 = vsel %vm893_vm8, 1, %v1822_v2  ;;  %vm890_vm9 = vcmp.le.f32.partialorder %v516_v47, %v1989_v16  ;;  %vm891_vm10 = vcmp.le.f32.partialorder %v516_v47, %v1991_v17 }
 0x18e   : > { %v1477_v51 = vadd.s32 %v1364_v40, %v1148_v49  ;;  %v1498_v52 = vadd.s32 %v1371_v48, %v1149_v50  ;;  %v1146_v53 = vsel %vm890_vm9, 1, %v1822_v2  ;;  %v1147_v54 = vsel %vm891_vm10, 1, %v1822_v2 }
 0x18f   : > { %v579_v55 = vpop.permute.xlu1 %578  ;;  %v575_v56 = vpop.permute.xlu0 %574 }
 0x190   : > { %v1460_v57 = vadd.s32 %v1477_v51, %v1146_v53  ;;  %v1467_v59 = vadd.s32 %v1498_v52, %v1147_v54  ;;  %vm920_vm11 = vcmp.le.f32.partialorder %v579_v55, %v1989_v16  ;;  %vm921_vm12 = vcmp.le.f32.partialorder %v579_v55, %v1991_v17 }
 0x191   : > { %v1176_v60 = vsel %vm920_vm11, 1, %v1822_v2  ;;  %v1177_v61 = vsel %vm921_vm12, 1, %v1822_v2  ;;  %vm918_vm13 = vcmp.le.f32.partialorder %v575_v56, %v1989_v16  ;;  %vm919_vm14 = vcmp.le.f32.partialorder %v575_v56, %v1991_v17 }
 0x192   : > { %v1446_v62 = vadd.s32 %v1460_v57, %v1176_v60  ;;  %v1453_v63 = vadd.s32 %v1467_v59, %v1177_v61  ;;  %v1174_v0 = vsel %vm918_vm13, 1, %v1822_v2  ;;  %v1175_v35 = vsel %vm919_vm14, 1, %v1822_v2 }
 0x193   : > { %v638_v7 = vpop.permute.xlu1 %637  ;;  %v634_v4 = vpop.permute.xlu0 %633 }
 0x194   : > { %v1433_v5 = vadd.s32 %v1446_v62, %v1174_v0  ;;  %v1440_v6 = vadd.s32 %v1453_v63, %v1175_v35  ;;  %vm948_vm15 = vcmp.le.f32.partialorder %v638_v7, %v1989_v16  ;;  %vm949_vm1 = vcmp.le.f32.partialorder %v638_v7, %v1991_v17 }
 0x195   : > { %v1204_v8 = vsel %vm948_vm15, 1, %v1822_v2  ;;  %v1205_v9 = vsel %vm949_vm1, 1, %v1822_v2  ;;  %vm946_vm2 = vcmp.le.f32.partialorder %v634_v4, %v1989_v16  ;;  %vm947_vm3 = vcmp.le.f32.partialorder %v634_v4, %v1991_v17 }
 0x196   : > { %v1419_v10 = vadd.s32 %v1433_v5, %v1204_v8  ;;  %v1426_v11 = vadd.s32 %v1440_v6, %v1205_v9  ;;  %v1202_v13 = vsel %vm946_vm2, 1, %v1822_v2  ;;  %v1203_v14 = vsel %vm947_vm3, 1, %v1822_v2 }
 0x197   : > { %v697_v15 = vpop.permute.xlu1 %696  ;;  %v693_v18 = vpop.permute.xlu0 %692 }
 0x198   : > { %v1406_v12 = vadd.s32 %v1419_v10, %v1202_v13  ;;  %v1413_v19 = vadd.s32 %v1426_v11, %v1203_v14  ;;  %vm976_vm4 = vcmp.le.f32.partialorder %v697_v15, %v1989_v16  ;;  %vm977_vm5 = vcmp.le.f32.partialorder %v697_v15, %v1991_v17 }
 0x199   : > { %v1232_v20 = vsel %vm976_vm4, 1, %v1822_v2  ;;  %v1233_v21 = vsel %vm977_vm5, 1, %v1822_v2  ;;  %vm974_vm6 = vcmp.le.f32.partialorder %v693_v18, %v1989_v16  ;;  %vm975_vm7 = vcmp.le.f32.partialorder %v693_v18, %v1991_v17 }
 0x19a   : > { %v1480_v22 = vadd.s32 %v1406_v12, %v1232_v20  ;;  %v1501_v23 = vadd.s32 %v1413_v19, %v1233_v21  ;;  %v1230_v24 = vsel %vm974_vm6, 1, %v1822_v2  ;;  %v1231_v25 = vsel %vm975_vm7, 1, %v1822_v2 }
 0x19b   : > { %v587_v26 = vpop.permute.xlu1 %586  ;;  %v583_v27 = vpop.permute.xlu0 %582 }
 0x19c   : > { %v1392_v28 = vadd.s32 %v1480_v22, %v1230_v24  ;;  %v1399_v29 = vadd.s32 %v1501_v23, %v1231_v25  ;;  %vm924_vm8 = vcmp.le.f32.partialorder %v587_v26, %v1989_v16  ;;  %vm925_vm9 = vcmp.le.f32.partialorder %v587_v26, %v1991_v17 }
 0x19d   : > { %v1180_v30 = vsel %vm924_vm8, 1, %v1822_v2  ;;  %v1181_v31 = vsel %vm925_vm9, 1, %v1822_v2  ;;  %vm922_vm10 = vcmp.le.f32.partialorder %v583_v27, %v1989_v16  ;;  %vm923_vm11 = vcmp.le.f32.partialorder %v583_v27, %v1991_v17 }
 0x19e   : > { %v1479_v32 = vadd.s32 %v1392_v28, %v1180_v30  ;;  %v1500_v33 = vadd.s32 %v1399_v29, %v1181_v31  ;;  %v1178_v34 = vsel %vm922_vm10, 1, %v1822_v2  ;;  %v1179_v36 = vsel %vm923_vm11, 1, %v1822_v2 }
 0x19f   : > { %v646_v37 = vpop.permute.xlu1 %645  ;;  %v642_v38 = vpop.permute.xlu0 %641  ;;  %v1823_v31 = vmov 1966171168  }
 0x1a0   : > { %v1461_v58 = vadd.s32 %v1479_v32, %v1178_v34  ;;  %v1468_v39 = vadd.s32 %v1500_v33, %v1179_v36  ;;  %vm952_vm12 = vcmp.le.f32.partialorder %v646_v37, %v1989_v16  ;;  %vm953_vm13 = vcmp.le.f32.partialorder %v646_v37, %v1991_v17 }
 0x1a1   : > { %v1208_v41 = vsel %vm952_vm12, 1, %v1822_v2  ;;  %v1209_v42 = vsel %vm953_vm13, 1, %v1822_v2  ;;  %vm950_vm14 = vcmp.le.f32.partialorder %v642_v38, %v1989_v16  ;;  %vm951_vm15 = vcmp.le.f32.partialorder %v642_v38, %v1991_v17 }
 0x1a2   : > { %v1447_v43 = vadd.s32 %v1461_v58, %v1208_v41  ;;  %v1454_v44 = vadd.s32 %v1468_v39, %v1209_v42  ;;  %v1206_v45 = vsel %vm950_vm14, 1, %v1822_v2  ;;  %v1207_v46 = vsel %vm951_vm15, 1, %v1822_v2 }
 0x1a3   : > { %v705_v47 = vpop.permute.xlu1 %704  ;;  %v701_v40 = vpop.permute.xlu0 %700  ;;  %v1515_v32 = vunpack.c.l.s4 %v1823_v31 }
 0x1a4   : > { %v1434_v48 = vadd.s32 %v1447_v43, %v1206_v45  ;;  %v1441_v49 = vadd.s32 %v1454_v44, %v1207_v46  ;;  %vm980_vm1 = vcmp.le.f32.partialorder %v705_v47, %v1989_v16  ;;  %vm981_vm2 = vcmp.le.f32.partialorder %v705_v47, %v1991_v17  ;;  %v1470_v45 = vld [vmem:[%s1964_s4] sm:$0x3] }
 0x1a5   : > { %v1236_v50 = vsel %vm980_vm1, 1, %v1822_v2  ;;  %v1237_v51 = vsel %vm981_vm2, 1, %v1822_v2  ;;  %vm978_vm3 = vcmp.le.f32.partialorder %v701_v40, %v1989_v16  ;;  %vm979_vm4 = vcmp.le.f32.partialorder %v701_v40, %v1991_v17 }
 0x1a6   : > { %v1482_v52 = vadd.s32 %v1434_v48, %v1236_v50  ;;  %v1503_v53 = vadd.s32 %v1441_v49, %v1237_v51  ;;  %v1234_v54 = vsel %vm978_vm3, 1, %v1822_v2  ;;  %v1235_v55 = vsel %vm979_vm4, 1, %v1822_v2 }
 0x1a7   : > { %v654_v56 = vpop.permute.xlu1 %653  ;;  %v650_v57 = vpop.permute.xlu0 %649 }
 0x1a8   : > { %v1420_v59 = vadd.s32 %v1482_v52, %v1234_v54  ;;  %v1427_v60 = vadd.s32 %v1503_v53, %v1235_v55  ;;  %vm956_vm5 = vcmp.le.f32.partialorder %v654_v56, %v1989_v16  ;;  %vm957_vm6 = vcmp.le.f32.partialorder %v654_v56, %v1991_v17 }
 0x1a9   : > { %v1212_v61 = vsel %vm956_vm5, 1, %v1822_v2  ;;  %v1213_v62 = vsel %vm957_vm6, 1, %v1822_v2  ;;  %vm954_vm7 = vcmp.le.f32.partialorder %v650_v57, %v1989_v16  ;;  %vm955_vm8 = vcmp.le.f32.partialorder %v650_v57, %v1991_v17 }
 0x1aa   : > { %v1481_v63 = vadd.s32 %v1420_v59, %v1212_v61  ;;  %v1502_v0 = vadd.s32 %v1427_v60, %v1213_v62  ;;  %v1210_v35 = vsel %vm954_vm7, 1, %v1822_v2  ;;  %v1211_v7 = vsel %vm955_vm8, 1, %v1822_v2 }
 0x1ab   : > { %v713_v4 = vpop.permute.xlu1 %712  ;;  %v709_v5 = vpop.permute.xlu0 %708 }
 0x1ac   : > { %v1462_v6 = vadd.s32 %v1481_v63, %v1210_v35  ;;  %v1469_v8 = vadd.s32 %v1502_v0, %v1211_v7  ;;  %vm984_vm9 = vcmp.le.f32.partialorder %v713_v4, %v1989_v16  ;;  %vm985_vm10 = vcmp.le.f32.partialorder %v713_v4, %v1991_v17 }
 0x1ad   : > { %v1240_v9 = vsel %vm984_vm9, 1, %v1822_v2  ;;  %v1241_v10 = vsel %vm985_vm10, 1, %v1822_v2  ;;  %vm982_vm11 = vcmp.le.f32.partialorder %v709_v5, %v1989_v16  ;;  %vm983_vm12 = vcmp.le.f32.partialorder %v709_v5, %v1991_v17 }
 0x1ae   : > { %v1484_v11 = vadd.s32 %v1462_v6, %v1240_v9  ;;  %v1505_v13 = vadd.s32 %v1469_v8, %v1241_v10  ;;  %v1238_v14 = vsel %vm982_vm11, 1, %v1822_v2  ;;  %v1239_v15 = vsel %vm983_vm12, 1, %v1822_v2 }
 0x1af   : > { %v721_v18 = vpop.permute.xlu1 %720  ;;  %v717_v12 = vpop.permute.xlu0 %716 }
 0x1b0   : > { %v1448_v19 = vadd.s32 %v1484_v11, %v1238_v14  ;;  %v1455_v20 = vadd.s32 %v1505_v13, %v1239_v15  ;;  %vm988_vm13 = vcmp.le.f32.partialorder %v721_v18, %v1989_v16  ;;  %vm989_vm14 = vcmp.le.f32.partialorder %v721_v18, %v1991_v17 }
 0x1b1   : > { %v1244_v21 = vsel %vm988_vm13, 1, %v1822_v2  ;;  %v1245_v22 = vsel %vm989_vm14, 1, %v1822_v2  ;;  %vm986_vm15 = vcmp.le.f32.partialorder %v717_v12, %v1989_v16  ;;  %vm987_vm1 = vcmp.le.f32.partialorder %v717_v12, %v1991_v17 }
 0x1b2   : > { %v1483_v23 = vadd.s32 %v1448_v19, %v1244_v21  ;;  %v1504_v24 = vadd.s32 %v1455_v20, %v1245_v22  ;;  %v1242_v25 = vsel %vm986_vm15, 1, %v1822_v2  ;;  %v1243_v26 = vsel %vm987_vm1, 1, %v1822_v2 }
 0x1b3   : > { %v1516_v17 = vunpack.c.0.s8 %v1515_v32 }
 0x1b4   : > { %v1485_v27 = vadd.s32 %v1483_v23, %v1242_v25  ;;  %v1506_v28 = vadd.s32 %v1504_v24, %v1243_v26 }
 0x1b5   : > { %v1519_v39 = vsub.s32 %v1516_v17, %v1970_v3 }
 0x1b6   : > { %v1486_v29 = vrot.slane %v1485_v27, 4  ;;  %v1507_v30 = vrot.slane %v1506_v28, 4 }
 0x1b8   : > { %v1487_v33 = vadd.s32 %v1486_v29, %v1485_v27  ;;  %v1508_v34 = vadd.s32 %v1507_v30, %v1506_v28 }
 0x1ba   : > { %v1488_v16 = vrot.slane %v1487_v33, 2  ;;  %v1509_v36 = vrot.slane %v1508_v34, 2 }
 0x1bc   : > { %v1489_v37 = vadd.s32 %v1488_v16, %v1487_v33  ;;  %v1510_v38 = vadd.s32 %v1509_v36, %v1508_v34 }
 0x1be   : > { %v1490_v58 = vrot.slane %v1489_v37, 1  ;;  %v1511_v2 = vrot.slane %v1510_v38, 1 }
 0x1c0   : > { %v1491_v41 = vadd.s32 %v1490_v58, %v1489_v37  ;;  %v1512_v42 = vadd.s32 %v1511_v2, %v1510_v38 }
 0x1c2   : > { %v1513_v43 = vcombine.low %v1491_v41, %v1512_v42 }
 0x1c4   : > { %v1520_v44 = vrot.slane %v1513_v43, %v1519_v39 }
 0x1c6   : > { %v1527_v46 = vrot.slane %v1520_v44, %v1519_v39 }
 0x1c8   : > { %v1528_v47 = vadd.s32 %v1527_v46, %v1470_v45 }
 0x1ca   : > { %1533 = vst.msk [vmem:[%s1964_s4] sm:$0x3] %vm1960_vm0, %v1528_v47 }
 0x1cb   : > { %1750 = shalt.err (!%p1747_p6)
}
 0x1cc   : > { %s1751_s27 = scalar_lea.hbm %s2592_s18, 32  ;;  %s1755_s3 = scalar_lea.hbm %s2646_s2, 64 }
 0x1cd   : > { %p1752_p4 = scmp.ne.s32.totalorder %s2592_s18, %s1751_s27  ;;  %p1756_p1 = scmp.lt.u32.totalorder %s2592_s18, %s2646_s2 }
 0x1ce   : > { %p1757_p2 = scmp.lt.u32.totalorder %s1755_s3, %s1751_s27  ;;  %p1759_p8 = scmp.lt.u32.totalorder %s1751_s27, %s2592_s18 }
 0x1cf   : > { %p1753_p10 = pnand %p1752_p4, %p2657_p9 }
 0x1d0   : > { %p1758_p5 = por %p1757_p2, %p1756_p1 }
 0x1d1   : > { %p1754_p12 = pneg %p1753_p10 }
 0x1d2   : > { %p1760_p11 = por %p1759_p8, %p1758_p5 }
 0x1d4   : > { %p1761_p0 = pnand %p1760_p11, %p1754_p12 }
 0x1d6   : > { %1764 = shalt.err (!%p1761_p0)
}
 0x1d7   : > { %1645 = dma.vmem_to_hbm [thread:$0]  (%p2657_p9), %s2594_s8, 32, %s2592_s18, %s1535_s19  }
 0x1d8 PF: > { %s1561_s4 = sand.u32 1, %s1799_s9   ;;  %p2658_p7 = scmp.ne.s32.totalorder %s2651_s24, 0 }
 0x1d9   : > { %p2659_p13 = scmp.ge.s32.totalorder %s1819_s14, 2  ;;  %s1562_s21 = scalar_lea.sflag [#allocation4], %s1561_s4 }
 0x1db   : > { %p1652_p3 = pnand %p2659_p13, %p2658_p7 }
 0x1dd   : > { %1794 = dma.done.wait (!%p1652_p3), %s1562_s21, 32  }
 0x1de   : > { %1796 = vsyncadd (!%p1652_p3), %s1562_s21, 4294967264  ;;  %s18_s14 = sadd.s32 1, %s1819_s14   ;;  %s2660_s9 = smov %s1803_s10 }
 0x1df   : > { %p15_p6 = scmp.ge.s32.totalorder %s18_s14, 4   ;;  %s2661_s10 = smov %s1807_s11 }
 0x1e0   : > { %s2662_s11 = smov %s1896_s23  ;;  %s2663_s12 = smov %s1815_s13 }
 0x1e1   : > { %s2664_s13 = smov %s2666_s17  ;;  %17 = sbr.rel (!%p15_p6) target bundleno = 6 (0x6), region = 77 }
 0x1e8   :  { %1567 = vsyncpa [#allocation3], 1 }
 0x1e9   :  { %1569 = vsyncpa [#allocation3 + $0x1], 1 }
 0x1ea   :  { %1570 = vsyncpa [#allocation4], 1 }
 0x1eb   :  { %1572 = vsyncpa [#allocation4 + $0x1], 1 }

</bundles_post_ra>
